<compile_context>
chip_gen: v7x
topology: tpu7x:2x2x1
jax: 0.10.0
libtpu: 0.0.40
codegen_flags: <defaults>
</compile_context>

<pallas_src>
import jax
import jax.numpy as jnp
from jax import lax
from jax.experimental import pallas as pl
from jax.experimental.pallas import tpu as pltpu


# ---------------- fused Encoder.forward -------------------------------------------------
def encoder_forward(x, params, alpha=0.2):
    B, N, K = x.shape
    T = params["w_taps"].shape[0]
    pad = (T - 1) // 2
    E = params["W_top"].shape[1]      # GATv2 embed_dim = 2 * window_size
    H = params["H"]
    H4 = 4 * H

    # --- tiny parameter prep (traced once by XLA) ---
    w_cat = params["w_taps"].reshape(T * K, K)                       # (T*K_in, K_out)
    a_blk = jnp.kron(jnp.eye(K, dtype=jnp.float32),
                     params["a_vec"].reshape(E, 1))                  # (K*E, K) block-diag of a
    conv_b = params["conv_b"].reshape(1, K)
    lin_b = params["lin_b"].reshape(1, E)
    b_lstm = params["b_lstm"].reshape(1, H4)

    TN = (((0,), (0,)), ((), ()))   # contract leading dims: A^T @ B
    NT = (((1,), (1,)), ((), ()))   # contract trailing dims: A @ B^T

    def kernel(x_ref, wc_ref, cb_ref, wt_ref, wb_ref, lb_ref, ab_ref, bm_ref,
               wih_ref, whh_ref, bl_ref, o_ref):
        # ---------------- ConvLayer: in-kernel pad + im2col + ONE matmul + ReLU ------
        xv = x_ref[0]                                                # (N, K)
        zp = jnp.zeros((pad, K), jnp.float32)
        xp = jnp.concatenate([zp, xv, zp], axis=0)                   # (N + 2*pad, K)
        s = jnp.concatenate([xp[j:j + N, :] for j in range(T)], axis=1)   # (N, T*K)
        conv = jnp.dot(s, wc_ref[...], preferred_element_type=jnp.float32) + cb_ref[...]
        conv = jnp.maximum(conv, 0.0)                                # (N, K)

        # -------------- FeatureAttentionLayer (GATv2, eval mode) ---------------------
        # node-major view x' = conv^T handled via transposed-contraction matmuls.
        l_emb = lax.dot_general(conv, wt_ref[...], TN,
                                preferred_element_type=jnp.float32) + lb_ref[...]   # (K, E)
        r_emb = lax.dot_general(conv, wb_ref[...], TN,
                                preferred_element_type=jnp.float32)                 # (K, E)
        # Z[i, j*E + d] = l_emb[i, d] + r_emb[j, d]   (2-D pair matrix via lane concat)
        l_t = jnp.concatenate([l_emb] * K, axis=1)                   # (K, K*E)
        r_t = jnp.concatenate([r_emb[j:j + 1, :] for j in range(K)], axis=1)  # (1, K*E)
        z = l_t + r_t
        z = jnp.where(z >= 0, z, alpha * z)                          # LeakyReLU
        e = jnp.dot(z, ab_ref[...], preferred_element_type=jnp.float32)       # (K, K)
        e = e + bm_ref[...]
        e = e - jnp.max(e, axis=-1, keepdims=True)
        p = jnp.exp(e)
        attn = p * pl.reciprocal(jnp.sum(p, axis=-1, keepdims=True), approx=True)
        # TODO(synk): attention dropout (torch.dropout, p=0.2) skipped -> eval-mode forward.
        # h_feat[n, i] = sigmoid(sum_j attn[i, j] * conv[n, j])  ((N, K) window-major view)
        h_feat = jax.nn.sigmoid(
            lax.dot_general(conv, attn, NT, preferred_element_type=jnp.float32))    # (N, K)

        # ---------------- LSTM (1 layer) over time -> last hidden state --------------
        h_cat = jnp.concatenate([conv, h_feat], axis=1)              # (N, 2K)
        # hoisted input projection: one matmul covers every timestep
        gx = jnp.dot(h_cat, wih_ref[...],
                     preferred_element_type=jnp.float32) + bl_ref[...]        # (N, 4H)
        hh = jnp.zeros((1, H), jnp.float32)
        cc = jnp.zeros((1, H), jnp.float32)
        for t in range(N):                                           # static unroll (N small)
            g = gx[t:t + 1, :] + jnp.dot(hh, whh_ref[...],
                                         preferred_element_type=jnp.float32)  # (1, 4H)
            i_g = jax.nn.sigmoid(g[:, 0:H])                          # PyTorch gate order i,f,g,o
            f_g = jax.nn.sigmoid(g[:, H:2 * H])
            g_g = jnp.tanh(g[:, 2 * H:3 * H])
            o_g = jax.nn.sigmoid(g[:, 3 * H:4 * H])
            cc = f_g * cc + i_g * g_g
            hh = o_g * jnp.tanh(cc)
        o_ref[0] = hh

    out = pl.pallas_call(
        kernel,
        out_shape=jax.ShapeDtypeStruct((B, 1, H), jnp.float32),
        grid=(B,),
        in_specs=[
            pl.BlockSpec((1, N, K), lambda b: (b, 0, 0)),            # x (per-batch block)
            pl.BlockSpec((T * K, K), lambda b: (0, 0)),              # conv weight (im2col layout)
            pl.BlockSpec((1, K), lambda b: (0, 0)),                  # conv bias
            pl.BlockSpec((N, E), lambda b: (0, 0)),                  # W_top
            pl.BlockSpec((N, E), lambda b: (0, 0)),                  # W_bot
            pl.BlockSpec((1, E), lambda b: (0, 0)),                  # lin bias
            pl.BlockSpec((K * E, K), lambda b: (0, 0)),              # block-diag attention vec
            pl.BlockSpec((K, K), lambda b: (0, 0)),                  # GAT bias matrix
            pl.BlockSpec((2 * K, H4), lambda b: (0, 0)),             # W_ih^T
            pl.BlockSpec((H, H4), lambda b: (0, 0)),                 # W_hh^T
            pl.BlockSpec((1, H4), lambda b: (0, 0)),                 # LSTM bias (b_ih + b_hh)
        ],
        out_specs=pl.BlockSpec((1, 1, H), lambda b: (b, 0, 0)),
        compiler_params=pltpu.CompilerParams(
            dimension_semantics=("parallel",)),                      # both TCs on v7x
    )(x, w_cat, conv_b, params["W_top"], params["W_bot"], lin_b,
      a_blk, params["bias_mat"], params["W_ih_T"], params["W_hh_T"], b_lstm)
    return out.reshape(B, H)                                         # == h_n.view(B, -1)


# ---------------- pure-JAX reference for verification -----------------------------------
def ref_forward(x, params, alpha=0.2):
    B, N, K = x.shape
    T = params["w_taps"].shape[0]
    pad = (T - 1) // 2
    H = params["H"]
    xpad = jnp.pad(x, ((0, 0), (pad, pad), (0, 0)))
    conv = jnp.zeros((B, N, K), jnp.float32)
    for j in range(T):
        conv = conv + jnp.einsum("bti,io->bto", xpad[:, j:j + N, :], params["w_taps"][j])
    conv = jnp.maximum(conv + params["conv_b"], 0.0)

    xv = jnp.transpose(conv, (0, 2, 1))                              # (B, K, N)
    L = xv @ params["W_top"] + params["lin_b"]
    R = xv @ params["W_bot"]
    Z = L[:, :, None, :] + R[:, None, :, :]
    Zl = jnp.where(Z >= 0, Z, alpha * Z)
    e = jnp.sum(Zl * params["a_vec"], axis=-1) + params["bias_mat"]
    attn = jax.nn.softmax(e, axis=-1)
    h = jax.nn.sigmoid(jnp.einsum("bij,bjn->bin", attn, xv))
    h_feat = jnp.transpose(h, (0, 2, 1))

    h_cat = jnp.concatenate([conv, h_feat], axis=2)

    def step(carry, xt):
        hh, cc = carry
        g = xt @ params["W_ih_T"] + hh @ params["W_hh_T"] + params["b_lstm"]
        i = jax.nn.sigmoid(g[:, 0:H])
        f = jax.nn.sigmoid(g[:, H:2 * H])
        gg = jnp.tanh(g[:, 2 * H:3 * H])
        o = jax.nn.sigmoid(g[:, 3 * H:4 * H])
        cc = f * cc + i * gg
        hh = o * jnp.tanh(cc)
        return (hh, cc), None

    (h_fin, _), _ = lax.scan(step, (jnp.zeros((B, H)), jnp.zeros((B, H))),
                             jnp.transpose(h_cat, (1, 0, 2)))
    return h_fin


if __name__ == "__main__":
    # Encoder(n_features=K, window_size=N, kernel_size=7, gru_hid_dim=H), eval mode.
    B, N, K, H, T = 2, 8, 4, 32, 7
    E = 2 * N            # GATv2 embed_dim = 2 * window_size
    alpha = 0.2

    key = jax.random.PRNGKey(0)
    ks = jax.random.split(key, 11)
    conv_w = jax.random.normal(ks[0], (K, K, T), jnp.float32) * 0.3     # Conv1d weight (out,in,tap)
    conv_b = jax.random.normal(ks[1], (K,), jnp.float32) * 0.1
    lin_Wt = jax.random.normal(ks[2], (2 * N, E), jnp.float32) * 0.3    # Linear weight, transposed (in,out)
    lin_b = jax.random.normal(ks[3], (E,), jnp.float32) * 0.1
    a_vec = jax.random.normal(ks[4], (E,), jnp.float32) * 0.3           # attention vector a
    bias_mat = jax.random.normal(ks[5], (K, K), jnp.float32) * 0.1      # GAT bias (KxK)
    W_ih = jax.random.normal(ks[6], (4 * H, 2 * K), jnp.float32) * 0.2  # LSTM weight_ih_l0
    W_hh = jax.random.normal(ks[7], (4 * H, H), jnp.float32) * 0.2      # LSTM weight_hh_l0
    b_ih = jax.random.normal(ks[8], (4 * H,), jnp.float32) * 0.1
    b_hh = jax.random.normal(ks[9], (4 * H,), jnp.float32) * 0.1
    x = jax.random.normal(ks[10], (B, N, K), jnp.float32)               # (batch, window, features)

    params = dict(
        w_taps=jnp.transpose(conv_w, (2, 1, 0)),   # (T, K_in, K_out)
        conv_b=conv_b,
        W_top=lin_Wt[:N],                          # acts on the "left" node of each pair
        W_bot=lin_Wt[N:],                          # acts on the "right" node of each pair
        lin_b=lin_b,
        a_vec=a_vec,
        bias_mat=bias_mat,
        W_ih_T=W_ih.T,                             # (2K, 4H)
        W_hh_T=W_hh.T,                             # (H, 4H)
        b_lstm=b_ih + b_hh,                        # (4H,)
        H=H,
    )

    out = encoder_forward(x, params, alpha)
    out = jax.block_until_ready(out)
    ref = ref_forward(x, params, alpha)
    assert out.shape == (B, H), out.shape
    max_diff = float(jnp.max(jnp.abs(out - ref)))
    assert jnp.allclose(out, ref, atol=2e-3, rtol=2e-3), f"max diff {max_diff}"
    print("KERNEL_OK")
</pallas_src>

<mosaic_0001>
module attributes {stable_mosaic.version = 11 : i64} {
  func.func @kernel(%arg0: i32, %arg1: memref<1x8x4xf32, #tpu.memory_space<vmem>>, %arg2: memref<28x4xf32, #tpu.memory_space<vmem>>, %arg3: memref<1x4xf32, #tpu.memory_space<vmem>>, %arg4: memref<8x16xf32, #tpu.memory_space<vmem>>, %arg5: memref<8x16xf32, #tpu.memory_space<vmem>>, %arg6: memref<1x16xf32, #tpu.memory_space<vmem>>, %arg7: memref<64x4xf32, #tpu.memory_space<vmem>>, %arg8: memref<4x4xf32, #tpu.memory_space<vmem>>, %arg9: memref<8x128xf32, #tpu.memory_space<vmem>>, %arg10: memref<32x128xf32, #tpu.memory_space<vmem>>, %arg11: memref<1x128xf32, #tpu.memory_space<vmem>>, %arg12: memref<1x1x32xf32, #tpu.memory_space<vmem>>) attributes {dimension_semantics = [#tpu.dimension_semantics<parallel>], iteration_bounds = array<i64: 2>, scalar_prefetch = 0 : i64, scratch_operands = 0 : i64, tpu.core_type = #tpu.core_type<tc>, window_params = [{transform_indices = @transform_0, window_bounds = array<i64: 1, 8, 4>}, {pipeline_mode = #tpu.pipeline_mode<synchronous>, transform_indices = @transform_1, window_bounds = array<i64: 28, 4>}, {pipeline_mode = #tpu.pipeline_mode<synchronous>, transform_indices = @transform_2, window_bounds = array<i64: 1, 4>}, {pipeline_mode = #tpu.pipeline_mode<synchronous>, transform_indices = @transform_3, window_bounds = array<i64: 8, 16>}, {pipeline_mode = #tpu.pipeline_mode<synchronous>, transform_indices = @transform_4, window_bounds = array<i64: 8, 16>}, {pipeline_mode = #tpu.pipeline_mode<synchronous>, transform_indices = @transform_5, window_bounds = array<i64: 1, 16>}, {pipeline_mode = #tpu.pipeline_mode<synchronous>, transform_indices = @transform_6, window_bounds = array<i64: 64, 4>}, {pipeline_mode = #tpu.pipeline_mode<synchronous>, transform_indices = @transform_7, window_bounds = array<i64: 4, 4>}, {pipeline_mode = #tpu.pipeline_mode<synchronous>, transform_indices = @transform_8, window_bounds = array<i64: 8, 128>}, {pipeline_mode = #tpu.pipeline_mode<synchronous>, transform_indices = @transform_9, window_bounds = array<i64: 32, 128>}, {pipeline_mode = #tpu.pipeline_mode<synchronous>, transform_indices = @transform_10, window_bounds = array<i64: 1, 128>}, {transform_indices = @transform_11, window_bounds = array<i64: 1, 1, 32>}]} {
    %c0 = arith.constant 0 : index
    %c0_0 = arith.constant 0 : index
    %c0_1 = arith.constant 0 : index
    %0 = vector.load %arg1[%c0, %c0_0, %c0_1] : memref<1x8x4xf32, #tpu.memory_space<vmem>>, vector<1x8x4xf32>
    %1 = vector.shape_cast %0 : vector<1x8x4xf32> to vector<8x4xf32>
    %cst = arith.constant 0.000000e+00 : f32
    %2 = vector.broadcast %cst : f32 to vector<3x4xf32>
    %3 = tpu.concatenate %2, %1, %2 in 0 : vector<3x4xf32>, vector<8x4xf32>, vector<3x4xf32> -> vector<14x4xf32>
    %4 = vector.extract_strided_slice %3 {offsets = [0, 0], sizes = [8, 4], strides = [1, 1]} : vector<14x4xf32> to vector<8x4xf32>
    %5 = vector.extract_strided_slice %3 {offsets = [1, 0], sizes = [8, 4], strides = [1, 1]} : vector<14x4xf32> to vector<8x4xf32>
    %6 = vector.extract_strided_slice %3 {offsets = [2, 0], sizes = [8, 4], strides = [1, 1]} : vector<14x4xf32> to vector<8x4xf32>
    %7 = vector.extract_strided_slice %3 {offsets = [3, 0], sizes = [8, 4], strides = [1, 1]} : vector<14x4xf32> to vector<8x4xf32>
    %8 = vector.extract_strided_slice %3 {offsets = [4, 0], sizes = [8, 4], strides = [1, 1]} : vector<14x4xf32> to vector<8x4xf32>
    %9 = vector.extract_strided_slice %3 {offsets = [5, 0], sizes = [8, 4], strides = [1, 1]} : vector<14x4xf32> to vector<8x4xf32>
    %10 = vector.extract_strided_slice %3 {offsets = [6, 0], sizes = [8, 4], strides = [1, 1]} : vector<14x4xf32> to vector<8x4xf32>
    %11 = tpu.concatenate %4, %5, %6, %7, %8, %9, %10 in 1 : vector<8x4xf32>, vector<8x4xf32>, vector<8x4xf32>, vector<8x4xf32>, vector<8x4xf32>, vector<8x4xf32>, vector<8x4xf32> -> vector<8x28xf32>
    %c0_2 = arith.constant 0 : index
    %c0_3 = arith.constant 0 : index
    %12 = vector.load %arg2[%c0_2, %c0_3] : memref<28x4xf32, #tpu.memory_space<vmem>>, vector<28x4xf32>
    %cst_4 = arith.constant dense<0.000000e+00> : vector<8x4xf32>
    %13 = tpu.matmul %11, %12, %cst_4 {dimension_numbers = #tpu.dot_dimension_numbers<[1], [0], [0], [1], [0, 0, 1, 1], [], []>} : vector<8x28xf32>, vector<28x4xf32>, vector<8x4xf32> -> vector<8x4xf32>
    %c0_5 = arith.constant 0 : index
    %c0_6 = arith.constant 0 : index
    %14 = vector.load %arg3[%c0_5, %c0_6] : memref<1x4xf32, #tpu.memory_space<vmem>>, vector<1x4xf32>
    %15 = vector.broadcast %14 : vector<1x4xf32> to vector<8x4xf32>
    %16 = arith.addf %13, %15 : vector<8x4xf32>
    %cst_7 = arith.constant 0.000000e+00 : f32
    %17 = vector.broadcast %cst_7 : f32 to vector<8x4xf32>
    %18 = arith.maximumf %16, %17 : vector<8x4xf32>
    %c0_8 = arith.constant 0 : index
    %c0_9 = arith.constant 0 : index
    %19 = vector.load %arg4[%c0_8, %c0_9] : memref<8x16xf32, #tpu.memory_space<vmem>>, vector<8x16xf32>
    %cst_10 = arith.constant dense<0.000000e+00> : vector<4x16xf32>
    %20 = tpu.matmul %18, %19, %cst_10 {dimension_numbers = #tpu.dot_dimension_numbers<[0], [0], [1], [1], [0, 1, 1, 1], [], []>} : vector<8x4xf32>, vector<8x16xf32>, vector<4x16xf32> -> vector<4x16xf32>
    %c0_11 = arith.constant 0 : index
    %c0_12 = arith.constant 0 : index
    %21 = vector.load %arg6[%c0_11, %c0_12] : memref<1x16xf32, #tpu.memory_space<vmem>>, vector<1x16xf32>
    %22 = vector.broadcast %21 : vector<1x16xf32> to vector<4x16xf32>
    %23 = arith.addf %20, %22 : vector<4x16xf32>
    %c0_13 = arith.constant 0 : index
    %c0_14 = arith.constant 0 : index
    %24 = vector.load %arg5[%c0_13, %c0_14] : memref<8x16xf32, #tpu.memory_space<vmem>>, vector<8x16xf32>
    %cst_15 = arith.constant dense<0.000000e+00> : vector<4x16xf32>
    %25 = tpu.matmul %18, %24, %cst_15 {dimension_numbers = #tpu.dot_dimension_numbers<[0], [0], [1], [1], [0, 1, 1, 1], [], []>} : vector<8x4xf32>, vector<8x16xf32>, vector<4x16xf32> -> vector<4x16xf32>
    %26 = tpu.concatenate %23, %23, %23, %23 in 1 : vector<4x16xf32>, vector<4x16xf32>, vector<4x16xf32>, vector<4x16xf32> -> vector<4x64xf32>
    %27 = vector.extract_strided_slice %25 {offsets = [0, 0], sizes = [1, 16], strides = [1, 1]} : vector<4x16xf32> to vector<1x16xf32>
    %28 = vector.extract_strided_slice %25 {offsets = [1, 0], sizes = [1, 16], strides = [1, 1]} : vector<4x16xf32> to vector<1x16xf32>
    %29 = vector.extract_strided_slice %25 {offsets = [2, 0], sizes = [1, 16], strides = [1, 1]} : vector<4x16xf32> to vector<1x16xf32>
    %30 = vector.extract_strided_slice %25 {offsets = [3, 0], sizes = [1, 16], strides = [1, 1]} : vector<4x16xf32> to vector<1x16xf32>
    %31 = tpu.concatenate %27, %28, %29, %30 in 1 : vector<1x16xf32>, vector<1x16xf32>, vector<1x16xf32>, vector<1x16xf32> -> vector<1x64xf32>
    %32 = vector.broadcast %31 : vector<1x64xf32> to vector<4x64xf32>
    %33 = arith.addf %26, %32 : vector<4x64xf32>
    %cst_16 = arith.constant 0.000000e+00 : f32
    %34 = vector.broadcast %cst_16 : f32 to vector<4x64xf32>
    %35 = arith.cmpf oge, %33, %34 : vector<4x64xf32>
    %cst_17 = arith.constant 2.000000e-01 : f32
    %36 = vector.broadcast %cst_17 : f32 to vector<4x64xf32>
    %37 = arith.mulf %36, %33 : vector<4x64xf32>
    %38 = arith.select %35, %33, %37 : vector<4x64xi1>, vector<4x64xf32>
    %c0_18 = arith.constant 0 : index
    %c0_19 = arith.constant 0 : index
    %39 = vector.load %arg7[%c0_18, %c0_19] : memref<64x4xf32, #tpu.memory_space<vmem>>, vector<64x4xf32>
    %cst_20 = arith.constant dense<0.000000e+00> : vector<4x4xf32>
    %40 = tpu.matmul %38, %39, %cst_20 {dimension_numbers = #tpu.dot_dimension_numbers<[1], [0], [0], [1], [0, 0, 1, 1], [], []>} : vector<4x64xf32>, vector<64x4xf32>, vector<4x4xf32> -> vector<4x4xf32>
    %c0_21 = arith.constant 0 : index
    %c0_22 = arith.constant 0 : index
    %41 = vector.load %arg8[%c0_21, %c0_22] : memref<4x4xf32, #tpu.memory_space<vmem>>, vector<4x4xf32>
    %42 = arith.addf %40, %41 : vector<4x4xf32>
    %cst_23 = arith.constant dense<0xFF800000> : vector<4xf32>
    %43 = vector.multi_reduction <maximumf>, %42, %cst_23 [1] : vector<4x4xf32> to vector<4xf32>
    %44 = vector.shape_cast %43 : vector<4xf32> to vector<4x1xf32>
    %45 = vector.broadcast %44 : vector<4x1xf32> to vector<4x4xf32>
    %46 = arith.subf %42, %45 : vector<4x4xf32>
    %47 = math.exp %46 : vector<4x4xf32>
    %cst_24 = arith.constant dense<0.000000e+00> : vector<4xf32>
    %48 = vector.multi_reduction <add>, %47, %cst_24 [1] : vector<4x4xf32> to vector<4xf32>
    %49 = vector.shape_cast %48 : vector<4xf32> to vector<4x1xf32>
    %50 = tpu.reciprocal %49 {approx = true} : vector<4x1xf32> -> vector<4x1xf32>
    %51 = vector.broadcast %50 : vector<4x1xf32> to vector<4x4xf32>
    %52 = arith.mulf %47, %51 : vector<4x4xf32>
    %cst_25 = arith.constant dense<0.000000e+00> : vector<8x4xf32>
    %53 = tpu.matmul %18, %52, %cst_25 {dimension_numbers = #tpu.dot_dimension_numbers<[1], [1], [0], [0], [0, 0, 1, 0], [], []>} : vector<8x4xf32>, vector<4x4xf32>, vector<8x4xf32> -> vector<8x4xf32>
    %54 = arith.negf %53 : vector<8x4xf32>
    %55 = math.exp %54 : vector<8x4xf32>
    %cst_26 = arith.constant 1.000000e+00 : f32
    %56 = vector.broadcast %cst_26 : f32 to vector<8x4xf32>
    %57 = arith.addf %56, %55 : vector<8x4xf32>
    %58 = arith.divf %56, %57 : vector<8x4xf32>
    %59 = tpu.concatenate %18, %58 in 1 : vector<8x4xf32>, vector<8x4xf32> -> vector<8x8xf32>
    %c0_27 = arith.constant 0 : index
    %c0_28 = arith.constant 0 : index
    %60 = vector.load %arg9[%c0_27, %c0_28] : memref<8x128xf32, #tpu.memory_space<vmem>>, vector<8x128xf32>
    %cst_29 = arith.constant dense<0.000000e+00> : vector<8x128xf32>
    %61 = tpu.matmul %59, %60, %cst_29 {dimension_numbers = #tpu.dot_dimension_numbers<[1], [0], [0], [1], [0, 0, 1, 1], [], []>} : vector<8x8xf32>, vector<8x128xf32>, vector<8x128xf32> -> vector<8x128xf32>
    %c0_30 = arith.constant 0 : index
    %c0_31 = arith.constant 0 : index
    %62 = vector.load %arg11[%c0_30, %c0_31] : memref<1x128xf32, #tpu.memory_space<vmem>>, vector<1x128xf32>
    %63 = vector.broadcast %62 : vector<1x128xf32> to vector<8x128xf32>
    %64 = arith.addf %61, %63 : vector<8x128xf32>
    %cst_32 = arith.constant 0.000000e+00 : f32
    %65 = vector.broadcast %cst_32 : f32 to vector<1x32xf32>
    %cst_33 = arith.constant 0.000000e+00 : f32
    %66 = vector.broadcast %cst_33 : f32 to vector<1x32xf32>
    %67 = vector.extract_strided_slice %64 {offsets = [0, 0], sizes = [1, 128], strides = [1, 1]} : vector<8x128xf32> to vector<1x128xf32>
    %c0_34 = arith.constant 0 : index
    %c0_35 = arith.constant 0 : index
    %68 = vector.load %arg10[%c0_34, %c0_35] : memref<32x128xf32, #tpu.memory_space<vmem>>, vector<32x128xf32>
    %cst_36 = arith.constant dense<0.000000e+00> : vector<1x128xf32>
    %69 = tpu.matmul %65, %68, %cst_36 {dimension_numbers = #tpu.dot_dimension_numbers<[1], [0], [0], [1], [0, 0, 1, 1], [], []>} : vector<1x32xf32>, vector<32x128xf32>, vector<1x128xf32> -> vector<1x128xf32>
    %70 = arith.addf %67, %69 : vector<1x128xf32>
    %71 = vector.extract_strided_slice %70 {offsets = [0, 0], sizes = [1, 32], strides = [1, 1]} : vector<1x128xf32> to vector<1x32xf32>
    %72 = arith.negf %71 : vector<1x32xf32>
    %73 = math.exp %72 : vector<1x32xf32>
    %cst_37 = arith.constant 1.000000e+00 : f32
    %74 = vector.broadcast %cst_37 : f32 to vector<1x32xf32>
    %75 = arith.addf %74, %73 : vector<1x32xf32>
    %76 = arith.divf %74, %75 : vector<1x32xf32>
    %77 = vector.extract_strided_slice %70 {offsets = [0, 32], sizes = [1, 32], strides = [1, 1]} : vector<1x128xf32> to vector<1x32xf32>
    %78 = arith.negf %77 : vector<1x32xf32>
    %79 = math.exp %78 : vector<1x32xf32>
    %cst_38 = arith.constant 1.000000e+00 : f32
    %80 = vector.broadcast %cst_38 : f32 to vector<1x32xf32>
    %81 = arith.addf %80, %79 : vector<1x32xf32>
    %82 = arith.divf %80, %81 : vector<1x32xf32>
    %83 = vector.extract_strided_slice %70 {offsets = [0, 64], sizes = [1, 32], strides = [1, 1]} : vector<1x128xf32> to vector<1x32xf32>
    %84 = math.tanh %83 : vector<1x32xf32>
    %85 = vector.extract_strided_slice %70 {offsets = [0, 96], sizes = [1, 32], strides = [1, 1]} : vector<1x128xf32> to vector<1x32xf32>
    %86 = arith.negf %85 : vector<1x32xf32>
    %87 = math.exp %86 : vector<1x32xf32>
    %cst_39 = arith.constant 1.000000e+00 : f32
    %88 = vector.broadcast %cst_39 : f32 to vector<1x32xf32>
    %89 = arith.addf %88, %87 : vector<1x32xf32>
    %90 = arith.divf %88, %89 : vector<1x32xf32>
    %91 = arith.mulf %82, %66 : vector<1x32xf32>
    %92 = arith.mulf %76, %84 : vector<1x32xf32>
    %93 = arith.addf %91, %92 : vector<1x32xf32>
    %94 = math.tanh %93 : vector<1x32xf32>
    %95 = arith.mulf %90, %94 : vector<1x32xf32>
    %96 = vector.extract_strided_slice %64 {offsets = [1, 0], sizes = [1, 128], strides = [1, 1]} : vector<8x128xf32> to vector<1x128xf32>
    %c0_40 = arith.constant 0 : index
    %c0_41 = arith.constant 0 : index
    %97 = vector.load %arg10[%c0_40, %c0_41] : memref<32x128xf32, #tpu.memory_space<vmem>>, vector<32x128xf32>
    %cst_42 = arith.constant dense<0.000000e+00> : vector<1x128xf32>
    %98 = tpu.matmul %95, %97, %cst_42 {dimension_numbers = #tpu.dot_dimension_numbers<[1], [0], [0], [1], [0, 0, 1, 1], [], []>} : vector<1x32xf32>, vector<32x128xf32>, vector<1x128xf32> -> vector<1x128xf32>
    %99 = arith.addf %96, %98 : vector<1x128xf32>
    %100 = vector.extract_strided_slice %99 {offsets = [0, 0], sizes = [1, 32], strides = [1, 1]} : vector<1x128xf32> to vector<1x32xf32>
    %101 = arith.negf %100 : vector<1x32xf32>
    %102 = math.exp %101 : vector<1x32xf32>
    %cst_43 = arith.constant 1.000000e+00 : f32
    %103 = vector.broadcast %cst_43 : f32 to vector<1x32xf32>
    %104 = arith.addf %103, %102 : vector<1x32xf32>
    %105 = arith.divf %103, %104 : vector<1x32xf32>
    %106 = vector.extract_strided_slice %99 {offsets = [0, 32], sizes = [1, 32], strides = [1, 1]} : vector<1x128xf32> to vector<1x32xf32>
    %107 = arith.negf %106 : vector<1x32xf32>
    %108 = math.exp %107 : vector<1x32xf32>
    %cst_44 = arith.constant 1.000000e+00 : f32
    %109 = vector.broadcast %cst_44 : f32 to vector<1x32xf32>
    %110 = arith.addf %109, %108 : vector<1x32xf32>
    %111 = arith.divf %109, %110 : vector<1x32xf32>
    %112 = vector.extract_strided_slice %99 {offsets = [0, 64], sizes = [1, 32], strides = [1, 1]} : vector<1x128xf32> to vector<1x32xf32>
    %113 = math.tanh %112 : vector<1x32xf32>
    %114 = vector.extract_strided_slice %99 {offsets = [0, 96], sizes = [1, 32], strides = [1, 1]} : vector<1x128xf32> to vector<1x32xf32>
    %115 = arith.negf %114 : vector<1x32xf32>
    %116 = math.exp %115 : vector<1x32xf32>
    %cst_45 = arith.constant 1.000000e+00 : f32
    %117 = vector.broadcast %cst_45 : f32 to vector<1x32xf32>
    %118 = arith.addf %117, %116 : vector<1x32xf32>
    %119 = arith.divf %117, %118 : vector<1x32xf32>
    %120 = arith.mulf %111, %93 : vector<1x32xf32>
    %121 = arith.mulf %105, %113 : vector<1x32xf32>
    %122 = arith.addf %120, %121 : vector<1x32xf32>
    %123 = math.tanh %122 : vector<1x32xf32>
    %124 = arith.mulf %119, %123 : vector<1x32xf32>
    %125 = vector.extract_strided_slice %64 {offsets = [2, 0], sizes = [1, 128], strides = [1, 1]} : vector<8x128xf32> to vector<1x128xf32>
    %c0_46 = arith.constant 0 : index
    %c0_47 = arith.constant 0 : index
    %126 = vector.load %arg10[%c0_46, %c0_47] : memref<32x128xf32, #tpu.memory_space<vmem>>, vector<32x128xf32>
    %cst_48 = arith.constant dense<0.000000e+00> : vector<1x128xf32>
    %127 = tpu.matmul %124, %126, %cst_48 {dimension_numbers = #tpu.dot_dimension_numbers<[1], [0], [0], [1], [0, 0, 1, 1], [], []>} : vector<1x32xf32>, vector<32x128xf32>, vector<1x128xf32> -> vector<1x128xf32>
    %128 = arith.addf %125, %127 : vector<1x128xf32>
    %129 = vector.extract_strided_slice %128 {offsets = [0, 0], sizes = [1, 32], strides = [1, 1]} : vector<1x128xf32> to vector<1x32xf32>
    %130 = arith.negf %129 : vector<1x32xf32>
    %131 = math.exp %130 : vector<1x32xf32>
    %cst_49 = arith.constant 1.000000e+00 : f32
    %132 = vector.broadcast %cst_49 : f32 to vector<1x32xf32>
    %133 = arith.addf %132, %131 : vector<1x32xf32>
    %134 = arith.divf %132, %133 : vector<1x32xf32>
    %135 = vector.extract_strided_slice %128 {offsets = [0, 32], sizes = [1, 32], strides = [1, 1]} : vector<1x128xf32> to vector<1x32xf32>
    %136 = arith.negf %135 : vector<1x32xf32>
    %137 = math.exp %136 : vector<1x32xf32>
    %cst_50 = arith.constant 1.000000e+00 : f32
    %138 = vector.broadcast %cst_50 : f32 to vector<1x32xf32>
    %139 = arith.addf %138, %137 : vector<1x32xf32>
    %140 = arith.divf %138, %139 : vector<1x32xf32>
    %141 = vector.extract_strided_slice %128 {offsets = [0, 64], sizes = [1, 32], strides = [1, 1]} : vector<1x128xf32> to vector<1x32xf32>
    %142 = math.tanh %141 : vector<1x32xf32>
    %143 = vector.extract_strided_slice %128 {offsets = [0, 96], sizes = [1, 32], strides = [1, 1]} : vector<1x128xf32> to vector<1x32xf32>
    %144 = arith.negf %143 : vector<1x32xf32>
    %145 = math.exp %144 : vector<1x32xf32>
    %cst_51 = arith.constant 1.000000e+00 : f32
    %146 = vector.broadcast %cst_51 : f32 to vector<1x32xf32>
    %147 = arith.addf %146, %145 : vector<1x32xf32>
    %148 = arith.divf %146, %147 : vector<1x32xf32>
    %149 = arith.mulf %140, %122 : vector<1x32xf32>
    %150 = arith.mulf %134, %142 : vector<1x32xf32>
    %151 = arith.addf %149, %150 : vector<1x32xf32>
    %152 = math.tanh %151 : vector<1x32xf32>
    %153 = arith.mulf %148, %152 : vector<1x32xf32>
    %154 = vector.extract_strided_slice %64 {offsets = [3, 0], sizes = [1, 128], strides = [1, 1]} : vector<8x128xf32> to vector<1x128xf32>
    %c0_52 = arith.constant 0 : index
    %c0_53 = arith.constant 0 : index
    %155 = vector.load %arg10[%c0_52, %c0_53] : memref<32x128xf32, #tpu.memory_space<vmem>>, vector<32x128xf32>
    %cst_54 = arith.constant dense<0.000000e+00> : vector<1x128xf32>
    %156 = tpu.matmul %153, %155, %cst_54 {dimension_numbers = #tpu.dot_dimension_numbers<[1], [0], [0], [1], [0, 0, 1, 1], [], []>} : vector<1x32xf32>, vector<32x128xf32>, vector<1x128xf32> -> vector<1x128xf32>
    %157 = arith.addf %154, %156 : vector<1x128xf32>
    %158 = vector.extract_strided_slice %157 {offsets = [0, 0], sizes = [1, 32], strides = [1, 1]} : vector<1x128xf32> to vector<1x32xf32>
    %159 = arith.negf %158 : vector<1x32xf32>
    %160 = math.exp %159 : vector<1x32xf32>
    %cst_55 = arith.constant 1.000000e+00 : f32
    %161 = vector.broadcast %cst_55 : f32 to vector<1x32xf32>
    %162 = arith.addf %161, %160 : vector<1x32xf32>
    %163 = arith.divf %161, %162 : vector<1x32xf32>
    %164 = vector.extract_strided_slice %157 {offsets = [0, 32], sizes = [1, 32], strides = [1, 1]} : vector<1x128xf32> to vector<1x32xf32>
    %165 = arith.negf %164 : vector<1x32xf32>
    %166 = math.exp %165 : vector<1x32xf32>
    %cst_56 = arith.constant 1.000000e+00 : f32
    %167 = vector.broadcast %cst_56 : f32 to vector<1x32xf32>
    %168 = arith.addf %167, %166 : vector<1x32xf32>
    %169 = arith.divf %167, %168 : vector<1x32xf32>
    %170 = vector.extract_strided_slice %157 {offsets = [0, 64], sizes = [1, 32], strides = [1, 1]} : vector<1x128xf32> to vector<1x32xf32>
    %171 = math.tanh %170 : vector<1x32xf32>
    %172 = vector.extract_strided_slice %157 {offsets = [0, 96], sizes = [1, 32], strides = [1, 1]} : vector<1x128xf32> to vector<1x32xf32>
    %173 = arith.negf %172 : vector<1x32xf32>
    %174 = math.exp %173 : vector<1x32xf32>
    %cst_57 = arith.constant 1.000000e+00 : f32
    %175 = vector.broadcast %cst_57 : f32 to vector<1x32xf32>
    %176 = arith.addf %175, %174 : vector<1x32xf32>
    %177 = arith.divf %175, %176 : vector<1x32xf32>
    %178 = arith.mulf %169, %151 : vector<1x32xf32>
    %179 = arith.mulf %163, %171 : vector<1x32xf32>
    %180 = arith.addf %178, %179 : vector<1x32xf32>
    %181 = math.tanh %180 : vector<1x32xf32>
    %182 = arith.mulf %177, %181 : vector<1x32xf32>
    %183 = vector.extract_strided_slice %64 {offsets = [4, 0], sizes = [1, 128], strides = [1, 1]} : vector<8x128xf32> to vector<1x128xf32>
    %c0_58 = arith.constant 0 : index
    %c0_59 = arith.constant 0 : index
    %184 = vector.load %arg10[%c0_58, %c0_59] : memref<32x128xf32, #tpu.memory_space<vmem>>, vector<32x128xf32>
    %cst_60 = arith.constant dense<0.000000e+00> : vector<1x128xf32>
    %185 = tpu.matmul %182, %184, %cst_60 {dimension_numbers = #tpu.dot_dimension_numbers<[1], [0], [0], [1], [0, 0, 1, 1], [], []>} : vector<1x32xf32>, vector<32x128xf32>, vector<1x128xf32> -> vector<1x128xf32>
    %186 = arith.addf %183, %185 : vector<1x128xf32>
    %187 = vector.extract_strided_slice %186 {offsets = [0, 0], sizes = [1, 32], strides = [1, 1]} : vector<1x128xf32> to vector<1x32xf32>
    %188 = arith.negf %187 : vector<1x32xf32>
    %189 = math.exp %188 : vector<1x32xf32>
    %cst_61 = arith.constant 1.000000e+00 : f32
    %190 = vector.broadcast %cst_61 : f32 to vector<1x32xf32>
    %191 = arith.addf %190, %189 : vector<1x32xf32>
    %192 = arith.divf %190, %191 : vector<1x32xf32>
    %193 = vector.extract_strided_slice %186 {offsets = [0, 32], sizes = [1, 32], strides = [1, 1]} : vector<1x128xf32> to vector<1x32xf32>
    %194 = arith.negf %193 : vector<1x32xf32>
    %195 = math.exp %194 : vector<1x32xf32>
    %cst_62 = arith.constant 1.000000e+00 : f32
    %196 = vector.broadcast %cst_62 : f32 to vector<1x32xf32>
    %197 = arith.addf %196, %195 : vector<1x32xf32>
    %198 = arith.divf %196, %197 : vector<1x32xf32>
    %199 = vector.extract_strided_slice %186 {offsets = [0, 64], sizes = [1, 32], strides = [1, 1]} : vector<1x128xf32> to vector<1x32xf32>
    %200 = math.tanh %199 : vector<1x32xf32>
    %201 = vector.extract_strided_slice %186 {offsets = [0, 96], sizes = [1, 32], strides = [1, 1]} : vector<1x128xf32> to vector<1x32xf32>
    %202 = arith.negf %201 : vector<1x32xf32>
    %203 = math.exp %202 : vector<1x32xf32>
    %cst_63 = arith.constant 1.000000e+00 : f32
    %204 = vector.broadcast %cst_63 : f32 to vector<1x32xf32>
    %205 = arith.addf %204, %203 : vector<1x32xf32>
    %206 = arith.divf %204, %205 : vector<1x32xf32>
    %207 = arith.mulf %198, %180 : vector<1x32xf32>
    %208 = arith.mulf %192, %200 : vector<1x32xf32>
    %209 = arith.addf %207, %208 : vector<1x32xf32>
    %210 = math.tanh %209 : vector<1x32xf32>
    %211 = arith.mulf %206, %210 : vector<1x32xf32>
    %212 = vector.extract_strided_slice %64 {offsets = [5, 0], sizes = [1, 128], strides = [1, 1]} : vector<8x128xf32> to vector<1x128xf32>
    %c0_64 = arith.constant 0 : index
    %c0_65 = arith.constant 0 : index
    %213 = vector.load %arg10[%c0_64, %c0_65] : memref<32x128xf32, #tpu.memory_space<vmem>>, vector<32x128xf32>
    %cst_66 = arith.constant dense<0.000000e+00> : vector<1x128xf32>
    %214 = tpu.matmul %211, %213, %cst_66 {dimension_numbers = #tpu.dot_dimension_numbers<[1], [0], [0], [1], [0, 0, 1, 1], [], []>} : vector<1x32xf32>, vector<32x128xf32>, vector<1x128xf32> -> vector<1x128xf32>
    %215 = arith.addf %212, %214 : vector<1x128xf32>
    %216 = vector.extract_strided_slice %215 {offsets = [0, 0], sizes = [1, 32], strides = [1, 1]} : vector<1x128xf32> to vector<1x32xf32>
    %217 = arith.negf %216 : vector<1x32xf32>
    %218 = math.exp %217 : vector<1x32xf32>
    %cst_67 = arith.constant 1.000000e+00 : f32
    %219 = vector.broadcast %cst_67 : f32 to vector<1x32xf32>
    %220 = arith.addf %219, %218 : vector<1x32xf32>
    %221 = arith.divf %219, %220 : vector<1x32xf32>
    %222 = vector.extract_strided_slice %215 {offsets = [0, 32], sizes = [1, 32], strides = [1, 1]} : vector<1x128xf32> to vector<1x32xf32>
    %223 = arith.negf %222 : vector<1x32xf32>
    %224 = math.exp %223 : vector<1x32xf32>
    %cst_68 = arith.constant 1.000000e+00 : f32
    %225 = vector.broadcast %cst_68 : f32 to vector<1x32xf32>
    %226 = arith.addf %225, %224 : vector<1x32xf32>
    %227 = arith.divf %225, %226 : vector<1x32xf32>
    %228 = vector.extract_strided_slice %215 {offsets = [0, 64], sizes = [1, 32], strides = [1, 1]} : vector<1x128xf32> to vector<1x32xf32>
    %229 = math.tanh %228 : vector<1x32xf32>
    %230 = vector.extract_strided_slice %215 {offsets = [0, 96], sizes = [1, 32], strides = [1, 1]} : vector<1x128xf32> to vector<1x32xf32>
    %231 = arith.negf %230 : vector<1x32xf32>
    %232 = math.exp %231 : vector<1x32xf32>
    %cst_69 = arith.constant 1.000000e+00 : f32
    %233 = vector.broadcast %cst_69 : f32 to vector<1x32xf32>
    %234 = arith.addf %233, %232 : vector<1x32xf32>
    %235 = arith.divf %233, %234 : vector<1x32xf32>
    %236 = arith.mulf %227, %209 : vector<1x32xf32>
    %237 = arith.mulf %221, %229 : vector<1x32xf32>
    %238 = arith.addf %236, %237 : vector<1x32xf32>
    %239 = math.tanh %238 : vector<1x32xf32>
    %240 = arith.mulf %235, %239 : vector<1x32xf32>
    %241 = vector.extract_strided_slice %64 {offsets = [6, 0], sizes = [1, 128], strides = [1, 1]} : vector<8x128xf32> to vector<1x128xf32>
    %c0_70 = arith.constant 0 : index
    %c0_71 = arith.constant 0 : index
    %242 = vector.load %arg10[%c0_70, %c0_71] : memref<32x128xf32, #tpu.memory_space<vmem>>, vector<32x128xf32>
    %cst_72 = arith.constant dense<0.000000e+00> : vector<1x128xf32>
    %243 = tpu.matmul %240, %242, %cst_72 {dimension_numbers = #tpu.dot_dimension_numbers<[1], [0], [0], [1], [0, 0, 1, 1], [], []>} : vector<1x32xf32>, vector<32x128xf32>, vector<1x128xf32> -> vector<1x128xf32>
    %244 = arith.addf %241, %243 : vector<1x128xf32>
    %245 = vector.extract_strided_slice %244 {offsets = [0, 0], sizes = [1, 32], strides = [1, 1]} : vector<1x128xf32> to vector<1x32xf32>
    %246 = arith.negf %245 : vector<1x32xf32>
    %247 = math.exp %246 : vector<1x32xf32>
    %cst_73 = arith.constant 1.000000e+00 : f32
    %248 = vector.broadcast %cst_73 : f32 to vector<1x32xf32>
    %249 = arith.addf %248, %247 : vector<1x32xf32>
    %250 = arith.divf %248, %249 : vector<1x32xf32>
    %251 = vector.extract_strided_slice %244 {offsets = [0, 32], sizes = [1, 32], strides = [1, 1]} : vector<1x128xf32> to vector<1x32xf32>
    %252 = arith.negf %251 : vector<1x32xf32>
    %253 = math.exp %252 : vector<1x32xf32>
    %cst_74 = arith.constant 1.000000e+00 : f32
    %254 = vector.broadcast %cst_74 : f32 to vector<1x32xf32>
    %255 = arith.addf %254, %253 : vector<1x32xf32>
    %256 = arith.divf %254, %255 : vector<1x32xf32>
    %257 = vector.extract_strided_slice %244 {offsets = [0, 64], sizes = [1, 32], strides = [1, 1]} : vector<1x128xf32> to vector<1x32xf32>
    %258 = math.tanh %257 : vector<1x32xf32>
    %259 = vector.extract_strided_slice %244 {offsets = [0, 96], sizes = [1, 32], strides = [1, 1]} : vector<1x128xf32> to vector<1x32xf32>
    %260 = arith.negf %259 : vector<1x32xf32>
    %261 = math.exp %260 : vector<1x32xf32>
    %cst_75 = arith.constant 1.000000e+00 : f32
    %262 = vector.broadcast %cst_75 : f32 to vector<1x32xf32>
    %263 = arith.addf %262, %261 : vector<1x32xf32>
    %264 = arith.divf %262, %263 : vector<1x32xf32>
    %265 = arith.mulf %256, %238 : vector<1x32xf32>
    %266 = arith.mulf %250, %258 : vector<1x32xf32>
    %267 = arith.addf %265, %266 : vector<1x32xf32>
    %268 = math.tanh %267 : vector<1x32xf32>
    %269 = arith.mulf %264, %268 : vector<1x32xf32>
    %270 = vector.extract_strided_slice %64 {offsets = [7, 0], sizes = [1, 128], strides = [1, 1]} : vector<8x128xf32> to vector<1x128xf32>
    %c0_76 = arith.constant 0 : index
    %c0_77 = arith.constant 0 : index
    %271 = vector.load %arg10[%c0_76, %c0_77] : memref<32x128xf32, #tpu.memory_space<vmem>>, vector<32x128xf32>
    %cst_78 = arith.constant dense<0.000000e+00> : vector<1x128xf32>
    %272 = tpu.matmul %269, %271, %cst_78 {dimension_numbers = #tpu.dot_dimension_numbers<[1], [0], [0], [1], [0, 0, 1, 1], [], []>} : vector<1x32xf32>, vector<32x128xf32>, vector<1x128xf32> -> vector<1x128xf32>
    %273 = arith.addf %270, %272 : vector<1x128xf32>
    %274 = vector.extract_strided_slice %273 {offsets = [0, 0], sizes = [1, 32], strides = [1, 1]} : vector<1x128xf32> to vector<1x32xf32>
    %275 = arith.negf %274 : vector<1x32xf32>
    %276 = math.exp %275 : vector<1x32xf32>
    %cst_79 = arith.constant 1.000000e+00 : f32
    %277 = vector.broadcast %cst_79 : f32 to vector<1x32xf32>
    %278 = arith.addf %277, %276 : vector<1x32xf32>
    %279 = arith.divf %277, %278 : vector<1x32xf32>
    %280 = vector.extract_strided_slice %273 {offsets = [0, 32], sizes = [1, 32], strides = [1, 1]} : vector<1x128xf32> to vector<1x32xf32>
    %281 = arith.negf %280 : vector<1x32xf32>
    %282 = math.exp %281 : vector<1x32xf32>
    %cst_80 = arith.constant 1.000000e+00 : f32
    %283 = vector.broadcast %cst_80 : f32 to vector<1x32xf32>
    %284 = arith.addf %283, %282 : vector<1x32xf32>
    %285 = arith.divf %283, %284 : vector<1x32xf32>
    %286 = vector.extract_strided_slice %273 {offsets = [0, 64], sizes = [1, 32], strides = [1, 1]} : vector<1x128xf32> to vector<1x32xf32>
    %287 = math.tanh %286 : vector<1x32xf32>
    %288 = vector.extract_strided_slice %273 {offsets = [0, 96], sizes = [1, 32], strides = [1, 1]} : vector<1x128xf32> to vector<1x32xf32>
    %289 = arith.negf %288 : vector<1x32xf32>
    %290 = math.exp %289 : vector<1x32xf32>
    %cst_81 = arith.constant 1.000000e+00 : f32
    %291 = vector.broadcast %cst_81 : f32 to vector<1x32xf32>
    %292 = arith.addf %291, %290 : vector<1x32xf32>
    %293 = arith.divf %291, %292 : vector<1x32xf32>
    %294 = arith.mulf %285, %267 : vector<1x32xf32>
    %295 = arith.mulf %279, %287 : vector<1x32xf32>
    %296 = arith.addf %294, %295 : vector<1x32xf32>
    %297 = math.tanh %296 : vector<1x32xf32>
    %298 = arith.mulf %293, %297 : vector<1x32xf32>
    %c0_82 = arith.constant 0 : index
    %c0_83 = arith.constant 0 : index
    %c0_84 = arith.constant 0 : index
    %299 = vector.load %arg12[%c0_82, %c0_83, %c0_84] : memref<1x1x32xf32, #tpu.memory_space<vmem>>, vector<1x1x32xf32>
    %300 = vector.shape_cast %299 : vector<1x1x32xf32> to vector<1x32xf32>
    %301 = vector.shape_cast %298 : vector<1x32xf32> to vector<1x1x32xf32>
    tpu.vector_store %arg12[%c0_82, %c0_83, %c0_84], %301 {strides = array<i32>} : memref<1x1x32xf32, #tpu.memory_space<vmem>>, vector<1x1x32xf32>,
    return
  }
  func.func @transform_0(%arg0: i32) -> (i32, i32, i32) {
    %c0_i32 = arith.constant 0 : i32
    %c0_i32_0 = arith.constant 0 : i32
    %c0_i32_1 = arith.constant 0 : i32
    return %arg0, %c0_i32, %c0_i32_0 : i32, i32, i32
  }
  func.func @transform_1(%arg0: i32) -> (i32, i32) {
    %c0_i32 = arith.constant 0 : i32
    %c0_i32_0 = arith.constant 0 : i32
    %c0_i32_1 = arith.constant 0 : i32
    return %c0_i32, %c0_i32_0 : i32, i32
  }
  func.func @transform_2(%arg0: i32) -> (i32, i32) {
    %c0_i32 = arith.constant 0 : i32
    %c0_i32_0 = arith.constant 0 : i32
    %c0_i32_1 = arith.constant 0 : i32
    return %c0_i32, %c0_i32_0 : i32, i32
  }
  func.func @transform_3(%arg0: i32) -> (i32, i32) {
    %c0_i32 = arith.constant 0 : i32
    %c0_i32_0 = arith.constant 0 : i32
    %c0_i32_1 = arith.constant 0 : i32
    return %c0_i32, %c0_i32_0 : i32, i32
  }
  func.func @transform_4(%arg0: i32) -> (i32, i32) {
    %c0_i32 = arith.constant 0 : i32
    %c0_i32_0 = arith.constant 0 : i32
    %c0_i32_1 = arith.constant 0 : i32
    return %c0_i32, %c0_i32_0 : i32, i32
  }
  func.func @transform_5(%arg0: i32) -> (i32, i32) {
    %c0_i32 = arith.constant 0 : i32
    %c0_i32_0 = arith.constant 0 : i32
    %c0_i32_1 = arith.constant 0 : i32
    return %c0_i32, %c0_i32_0 : i32, i32
  }
  func.func @transform_6(%arg0: i32) -> (i32, i32) {
    %c0_i32 = arith.constant 0 : i32
    %c0_i32_0 = arith.constant 0 : i32
    %c0_i32_1 = arith.constant 0 : i32
    return %c0_i32, %c0_i32_0 : i32, i32
  }
  func.func @transform_7(%arg0: i32) -> (i32, i32) {
    %c0_i32 = arith.constant 0 : i32
    %c0_i32_0 = arith.constant 0 : i32
    %c0_i32_1 = arith.constant 0 : i32
    return %c0_i32, %c0_i32_0 : i32, i32
  }
  func.func @transform_8(%arg0: i32) -> (i32, i32) {
    %c0_i32 = arith.constant 0 : i32
    %c0_i32_0 = arith.constant 0 : i32
    %c0_i32_1 = arith.constant 0 : i32
    return %c0_i32, %c0_i32_0 : i32, i32
  }
  func.func @transform_9(%arg0: i32) -> (i32, i32) {
    %c0_i32 = arith.constant 0 : i32
    %c0_i32_0 = arith.constant 0 : i32
    %c0_i32_1 = arith.constant 0 : i32
    return %c0_i32, %c0_i32_0 : i32, i32
  }
  func.func @transform_10(%arg0: i32) -> (i32, i32) {
    %c0_i32 = arith.constant 0 : i32
    %c0_i32_0 = arith.constant 0 : i32
    %c0_i32_1 = arith.constant 0 : i32
    return %c0_i32, %c0_i32_0 : i32, i32
  }
  func.func @transform_11(%arg0: i32) -> (i32, i32, i32) {
    %c0_i32 = arith.constant 0 : i32
    %c0_i32_0 = arith.constant 0 : i32
    %c0_i32_1 = arith.constant 0 : i32
    return %arg0, %c0_i32, %c0_i32_0 : i32, i32, i32
  }
}

</mosaic_0001>

<bundles_post_ra>
// kernel: tpu_custom_call.1
= control target key start
LH: loop header
LB: loop body
LE: loop exit
PB: predicated region body
PF: predicated region fallthrough
CT: control target
= control target key end

     0   :  { %16 = vsyncpa [#allocation3], 0  ;;  %s2832_s0 = inlined_call_operand.vmem [shape: f32[2,8,4], index: 0, kind: input, shape index: {}]   ;;  %s2833_s1 = inlined_call_operand.vmem [shape: f32[28,4], index: 1, kind: input, shape index: {}]   ;;  %s2834_s2 = inlined_call_operand.vmem [shape: f32[1,4], index: 2, kind: input, shape index: {}]   ;;  %s2835_s3 = inlined_call_operand.vmem [shape: f32[8,16], index: 3, kind: input, shape index: {}]   ;;  %s2836_s4 = inlined_call_operand.vmem [shape: f32[8,16], index: 4, kind: input, shape index: {}]   ;;  %s2837_s5 = inlined_call_operand.vmem [shape: f32[1,16], index: 5, kind: input, shape index: {}]   ;;  %s2838_s6 = inlined_call_operand.vmem [shape: f32[64,4], index: 6, kind: input, shape index: {}]   ;;  %s2839_s7 = inlined_call_operand.vmem [shape: f32[4,4], index: 7, kind: input, shape index: {}]   ;;  %s2840_s8 = inlined_call_operand.vmem [shape: f32[8,128], index: 8, kind: input, shape index: {}]   ;;  %s2841_s9 = inlined_call_operand.vmem [shape: f32[32,128], index: 9, kind: input, shape index: {}]   ;;  %s2842_s10 = inlined_call_operand.vmem [shape: f32[1,128], index: 10, kind: input, shape index: {}]   ;;  %s2843_s11 = inlined_call_operand.hbm [shape: f32[2,1,32], index: 11, kind: output, shape index: {}]  }
   0x1   :  { %18 = vsyncpa [#allocation3 + $0x1], 0  ;;  %s2506_s17 = smov 0   ;;  %s2508_s18 = smov 0  }
   0x2   :  { %s2510_s19 = smov 0   ;;  %s2512_s20 = smov 0  }
   0x3 LB: > { %2847 = sst [smem:[#allocation5_spill]] %s2426_s19  ;;  %s2527_s21 = sadd.s32 4294967295, %s2430_s20   ;;  %s2430_s20 = sphi %s2512_s20, %s2852_s20   ;;  %s2426_s19 = sphi %s2510_s19, %s2854_s19   ;;  %s2422_s18 = sphi %s2508_s18, %s2856_s18   ;;  %s2418_s17 = sphi %s2506_s17, %s2855_s17  }
   0x4   : > { %s1942_s22 = sadd.s32 4294967294, %s2430_s20   ;;  %s2531_s23 = sadd.s32 1, %s2430_s20  }
   0x5   : > { %2848 = sst [smem:[#allocation6_spill]] %s2531_s23  ;;  %s267_s24 = sadd.s32 1, %s2426_s19 }
   0x6   : > { %s264_s25 = ssub.s32 %s2430_s20, %s2531_s23  ;;  %p277_p0 = scmp.ne.s32.totalorder %s2426_s19, %s2422_s18 }
   0x7   : > { %p265_p1 = scmp.eq.s32.totalorder %s264_s25, 0  ;;  %p278_p2 = scmp.eq.s32.totalorder %s2527_s21, 1 }
   0x8   : > { %p283_p3 = scmp.ne.s32.totalorder %s2422_s18, %s2418_s17  ;;  %p284_p4 = scmp.eq.s32.totalorder %s1942_s22, 1 }
   0x9   : > { %s2542_s26 = scalar_select %p265_p1, %s2426_s19, %s267_s24  }
   0xa   : > { %p2544_p5 = por %p278_p2, %p277_p0  ;;  %p2548_p6 = por %p284_p4, %p283_p3 }
   0xb   : > { %2849 = sst [smem:[#allocation7_spill]] %s2542_s26  ;;  %p1945_p7 = scmp.ge.s32.totalorder %s2430_s20, 1 }
   0xc   : > { %p339_p8 = scmp.lt.s32.totalorder %s2430_s20, 3 }
   0xe   : > { %p340_p9 = pnand %p1945_p7, %p339_p8 }
   0xf   : > { %p377_p10 = scmp.lt.s32.totalorder (!%p340_p9), %s2527_s21, 1  ;;  %v2432_v0 = vmov (!%p340_p9), 0.0|0.0   ;;  %v443_v1 = vld [vmem:[%s2833_s1] sm:$0xff] (!%p340_p9)  ;;  %v444_v2 = vld [vmem:[%s2833_s1 + $0x8] sm:$0xff] (!%p340_p9)  ;;  %v445_v4 = vld [vmem:[%s2833_s1 + $0x10] sm:$0xff] (!%p340_p9)  ;;  %vm411_vm0 = vcmask (!%p340_p9), 1043456  }
  0x10   : > { %343 = sbr.rel (%p340_p9) target bundleno = 7408 (0x1cf0), region = 64  ;;  %2177 = vmatprep.subr.bf16.mxu0 (!%p340_p9), %v2432_v0  ;;  %v2178_v3 = vpack.c.bf16 (!%p340_p9), %v444_v2, %v443_v1  ;;  %v446_v5 = vld [vmem:[%s2833_s1 + $0x18] sm:$0xf] (!%p340_p9)  ;;  %vm385_vm1 = vcmask (!%p340_p9), 1042432   ;;  %vm2433_vm2 = vmmov (!%p340_p9), 1   ;;  %vm390_vm4 = vcmask (!%p340_p9), 1046528  }
  0x11   : > { %v2181_v7 = vpack.c.bf16 (!%p340_p9), %v446_v5, %v445_v4  ;;  %vm2182_vm3 = vmpackc.low (!%p340_p9), %vm411_vm0, %vm2433_vm2  ;;  %vm404_vm5 = vcmask (!%p340_p9), 1044480   ;;  %vm397_vm6 = vcmask (!%p340_p9), 1045504   ;;  %vm2434_vm7 = vmmov (!%p340_p9), 0   ;;  %s2436_s19 = smov (!%p340_p9), 4   ;;  %s2437_s23 = smov (!%p340_p9), 12   ;;  %v532_v42 = vld [vmem:[%s2835_s3] sm:$0xff] (!%p340_p9) }
  0x12   : > { %2179 = vmatpush3.bf16.msra.mxu0 (!%p340_p9), %v2178_v3  ;;  %v2435_v11 = vmov (!%p340_p9), 0.0   ;;  %vm424_vm8 = vcmask (!%p340_p9), 1041408   ;;  %s2440_s30 = smov (!%p340_p9), 20   ;;  %s2441_s12 = smov (!%p340_p9), 24   ;;  %vm431_vm9 = vcmask (!%p340_p9), 31744   ;;  %vm433_vm10 = vcmask (!%p340_p9), 64512  }
  0x13   : > { %2180 = vmatprep.subr.bf16.mxu0 (!%p340_p9), %v2432_v0  ;;  %2047 = vmatprep.mubr.msk.f32.mxu0 (!%p340_p9), %vm2434_vm7, %v2435_v11  ;;  %vm435_vm11 = vcmask (!%p340_p9), 97280   ;;  %vm437_vm12 = vcmask (!%p340_p9), 130048   ;;  %vm439_vm13 = vcmask (!%p340_p9), 162816   ;;  %vm441_vm14 = vcmask (!%p340_p9), 195584   ;;  %v645_v43 = vld [vmem:[%s2836_s4] sm:$0xff] (!%p340_p9)  ;;  %v756_v51 = vld [vmem:[%s2838_s6 + $0x8] sm:$0xff] (!%p340_p9) }
  0x14   : > { %2055 = vmatprep.subr.mxu1 (!%p340_p9), %v2435_v11  ;;  %2057 = vmatprep.mubr.msk.f32.mxu1 (!%p340_p9), %vm2434_vm7, %v2435_v11  ;;  %vm454_vm15 = vcmask (!%p340_p9), 228352   ;;  %v1947_v44 = vld [vmem:[%s2834_s2] ss:$0 sm:$0xff] (!%p340_p9)  ;;  %v757_v58 = vld [vmem:[%s2838_s6 + $0x10] sm:$0xff] (!%p340_p9)  ;;  %v758_v59 = vld [vmem:[%s2838_s6 + $0x18] sm:$0xff] (!%p340_p9)  ;;  %s2443_s16 = smov (!%p340_p9), 48  }
  0x15   : > { %2056 = vmatpush3.msra.mxu1 (!%p340_p9), %v645_v43  ;;  %v755_v50 = vld [vmem:[%s2838_s6] sm:$0xff] (!%p340_p9)  ;;  %v2188_v60 = vpack.c.bf16 (!%p340_p9), %v758_v59, %v757_v58  ;;  %v760_v1 = vld [vmem:[%s2838_s6 + $0x28] sm:$0xff] (!%p340_p9)  ;;  %v761_v4 = vld [vmem:[%s2838_s6 + $0x30] sm:$0xff] (!%p340_p9)  ;;  %s2444_s24 = smov (!%p340_p9), 64   ;;  %s375_s25 = sand.u32 (!%p340_p9), 1, %s2422_s18  }
  0x16   : > { %2183 = vmatpush3.bf16.msk.msra.mxu0 (!%p340_p9), %vm2182_vm3, %v2181_v7  ;;  %2184 = vmatprep.subr.bf16.mxu1 (!%p340_p9), %v2432_v0  ;;  %v2185_v52 = vpack.c.bf16 (!%p340_p9), %v756_v51, %v755_v50  ;;  %v1950_v62 = vld [vmem:[%s2837_s5] ss:$0 sm:$0xff] (!%p340_p9)  ;;  %v762_v5 = vld [vmem:[%s2838_s6 + $0x38] sm:$0xff] (!%p340_p9)  ;;  %vm764_vm3 = vcmask (!%p340_p9), 523264   ;;  %v1020_v51 = vld [vmem:[%s2841_s9 + $0x10] sm:$0xff] (!%p340_p9) }
  0x17   : > { %s378_s29 = scalar_select %p377_p10, %s2527_s21, 1  ;;  %2050 = vmatprep.subr.mxu0 %v2435_v11  ;;  %v759_v63 = vld [vmem:[%s2838_s6 + $0x20] sm:$0xff] }
  0x18   : > { %v2191_v2 = vpack.c.bf16 %v760_v1, %v759_v63  ;;  %v1957_v58 = vld [vmem:[%s2842_s10] ss:$0 sm:$0xff] }
  0x19   : > { %s1946_s15 = sshll.u32 %s378_s29, 3  ;;  %s2439_s29 = smov 16  }
  0x1a   : > { %s380_s26 = scalar_lea.vmem %s2832_s0, %s1946_s15 }
  0x1b   : > { %v381_v6 = vld [vmem:[%s380_s26] sm:$0xff]  ;;  %s2438_s26 = smov 8  }
  0x1c   : > { %v383_v8 = vrot.slane %v381_v6, 5  ;;  %v2194_v6 = vpack.c.bf16 %v762_v5, %v761_v4 }
  0x1e   : > { %v386_v9 = vsel %vm385_vm1, 0.0, %v383_v8  ;;  %v387_v10 = vsel %vm385_vm1, %v383_v8, 0.0 }
  0x1f   : > { %v391_v12 = vrot.slane %v386_v9, 1  ;;  %v392_v13 = vrot.slane %v387_v10, 1  ;;  %v405_v14 = vrot.slane %v386_v9, 3  ;;  %v406_v15 = vrot.slane %v387_v10, 3 }
  0x20   : > { %v398_v16 = vrot.slane %v386_v9, 2  ;;  %v399_v17 = vrot.slane %v387_v10, 2  ;;  %v412_v18 = vrot.slane %v386_v9, 4  ;;  %v413_v19 = vrot.slane %v387_v10, 4 }
  0x21   : > { %v393_v20 = vsel %vm390_vm4, %v391_v12, %v392_v13  ;;  %v407_v21 = vsel %vm404_vm5, %v405_v14, %v406_v15  ;;  %v418_v22 = vrot.slane %v386_v9, 5  ;;  %v419_v23 = vrot.slane %v387_v10, 5 }
  0x22   : > { %394 = vrot.lane.b32.xlu0 %v393_v20, %s2436_s19  ;;  %408 = vrot.lane.b32.xlu1 %v407_v21, %s2437_s23  ;;  %v400_v24 = vsel %vm397_vm6, %v398_v16, %v399_v17  ;;  %v414_v25 = vsel %vm411_vm0, %v412_v18, %v413_v19  ;;  %v425_v26 = vrot.slane %v386_v9, 6  ;;  %v426_v27 = vrot.slane %v387_v10, 6  ;;  %s1974_s23 = sshll.u32 %s2527_s21, 4  ;;  %s2445_s21 = smov [#allocation2]  }
  0x23   : > { %v420_v28 = vsel %vm385_vm1, %v418_v22, %v419_v23  ;;  %v747_v12 = vlaneseq  ;;  %vm727_vm0 = vcmask 261120   ;;  %vm729_vm1 = vcmask 392192   ;;  %s2790_s15 = scalar_lea.hbm %s2843_s11, %s1974_s23 }
  0x24   : > { %v427_v29 = vsel %vm424_vm8, %v425_v26, %v426_v27  ;;  %vm838_vm4 = vcmask 27648   ;;  %vm1872_vm5 = vcmask 261127  }
  0x25   : > { %v748_v13 = vshrl.u32 %v747_v12, 7 }
  0x26   : > { %401 = vrot.lane.b32.xlu0 %v400_v24, %s2438_s26  ;;  %415 = vrot.lane.b32.xlu1 %v414_v25, %s2439_s29  ;;  %s376_s26 = scalar_lea.vmem [#allocation2], %s375_s25 }
  0x27   : > { %v749_v17 = vsub.s32 0, %v748_v13 }
  0x2a   : > { %421 = vrot.lane.b32.xlu0 %v420_v28, %s2440_s30  ;;  %428 = vrot.lane.b32.xlu1 %v427_v29, %s2441_s12  ;;  %s2442_s30 = smov 32   ;;  %v763_v28 = vld [vmem:[%s2839_s7] sm:$0xf]  ;;  %s1887_s12 = sshll.u32 %s376_s26, 4  ;;  %s2792_s12 = int_to_ptr.vmem [resolvable:$true] %s1887_s12 }
  0x94   : > { %v395_v30 = vpop.permute.xlu0 %394  ;;  %v409_v31 = vpop.permute.xlu1 %408 }
  0x95   : > { %v432_v32 = vsel %vm431_vm9, %v386_v9, %v395_v30 }
  0x98   : > { %v402_v33 = vpop.permute.xlu0 %401  ;;  %v416_v34 = vpop.permute.xlu1 %415 }
  0x99   : > { %v434_v35 = vsel %vm433_vm10, %v432_v32, %v402_v33 }
  0x9a   : > { %v436_v36 = vsel %vm435_vm11, %v434_v35, %v409_v31 }
  0x9b   : > { %v438_v37 = vsel %vm437_vm12, %v436_v36, %v416_v34 }
  0x9c   : > { %v422_v38 = vpop.permute.xlu0 %421  ;;  %v429_v39 = vpop.permute.xlu1 %428 }
  0x9d   : > { %v440_v40 = vsel %vm439_vm13, %v438_v37, %v422_v38 }
  0x9e   : > { %v442_v41 = vsel %vm441_vm14, %v440_v40, %v429_v39 }
  0x9f   : > { %2048 = vmatmul.mubr.msk.f32.vlgmr.msra.gmra.mrb[0].mxu0 %vm454_vm15, %v442_v41  ;;  %v937_v41 = vld [vmem:[%s2840_s8] sm:$0xff] }
  0xa0   : > { %2052 = vmatprep.mubr.msk.f32.mxu0 %vm2434_vm7, %v2435_v11  ;;  %2051 = vmatpush3.msra.mxu0 %v532_v42 }
  0xa1   : > { %2079 = vmatprep.subr.mxu0 %v2435_v11 }
 0x172   : > { %v527_v45 = vpop.f32.mrb[0].mxu0 }
 0x173   : > { %v528_v46 = vadd.f32 %v1947_v44, %v527_v45  ;;  %v2049_v47 = vpop.f32.mrb[1].mxu0  ;;  %v1018_v45 = vld [vmem:[%s2841_s9] sm:$0xff] }
 0x175   : > { %v2605_v48 = vmax.f32 %v528_v46, 0.0  ;;  %v1019_v46 = vld [vmem:[%s2841_s9 + $0x8] sm:$0xff] }
 0x177   : > { %540 = vxpose.xlu0.b32.start.end [1/1] (short) (narrow) %v2605_v48, 8 }
 0x1f7   : > { %v556_v49 = vpop.trf.xlu0 }
 0x1f8   : > { %2053 = vmatmul.mubr.msk.f32.vlgmr.msra.gmra.mrb[2].mxu0 %vm433_vm10, %v556_v49  ;;  %2058 = vmatmul.mubr.msk.f32.vlgmr.msra.gmra.mrb[0].mxu1 %vm433_vm10, %v556_v49  ;;  %v2674_v49 = vpack.c.bf16 %v1019_v46, %v1018_v45 }
 0x1f9   : > { %2076 = vmatprep.mubr.msk.f32.mxu1 %vm2434_vm7, %v2435_v11  ;;  %2081 = vmatprep.mubr.msk.f32.mxu0 %vm2434_vm7, %v2435_v11 }
 0x1fa   : > { %2186 = vmatpush3.bf16.msra.mxu1 %v2185_v52  ;;  %v1021_v52 = vld [vmem:[%s2841_s9 + $0x18] sm:$0xff] }
 0x1fb   : > { %2187 = vmatprep.subr.bf16.mxu1 %v2432_v0 }
 0x1fe   : > { %2189 = vmatpush3.bf16.msra.mxu1 %v2188_v60 }
 0x1ff   : > { %2190 = vmatprep.subr.bf16.mxu1 %v2432_v0 }
 0x202   : > { %2192 = vmatpush3.bf16.msra.mxu1 %v2191_v2 }
 0x203   : > { %2193 = vmatprep.subr.bf16.mxu1 %v2432_v0 }
 0x206   : > { %2195 = vmatpush3.bf16.msra.mxu1 %v2194_v6 }
 0x207   : > { %2202 = vmatprep.subr.bf16.mxu1 %v2432_v0 }
 0x2cb   : > { %v641_v53 = vpop.f32.mrb[2].mxu0  ;;  %v712_v54 = vpop.f32.mrb[0].mxu1 }
 0x2cc   : > { %v2054_v55 = vpop.f32.mrb[3].mxu0  ;;  %v2059_v56 = vpop.f32.mrb[1].mxu1  ;;  %v732_v57 = vrot.slane %v712_v54, 1  ;;  %v736_v61 = vrot.slane %v712_v54, 2  ;;  %v642_v3 = vadd.f32 %v1950_v62, %v641_v53  ;;  %v740_v7 = vrot.slane %v712_v54, 3 }
 0x2cd   : > { %v2684_v53 = vpack.c.bf16 %v1021_v52, %v1020_v51 }
 0x2ce   : > { %733 = vrot.lane.b32.xlu1 %v732_v57, %s2439_s29 }
 0x2d2   : > { %737 = vrot.lane.b32.xlu1 %v736_v61, %s2442_s30 }
 0x2d6   : > { %717 = vrot.lane.b32.xlu1 %v642_v3, %s2439_s29  ;;  %s2368_s29 = scalar_lea.vmem %s2792_s12, 16 }
 0x2d7   : > { %p2369_p11 = scmp.ne.s32.totalorder %s2792_s12, %s2368_s29 }
 0x2d9   : > { %p2370_p12 = pnand %p2369_p11, %p2544_p5 }
 0x2da   : > { %741 = vrot.lane.b32.xlu1 %v740_v7, %s2443_s16 }
 0x2db   : > { %p2371_p13 = pneg %p2370_p12 }
 0x2de   : > { %720 = vrot.lane.b32.xlu1 %v642_v3, %s2442_s30 }
 0x2e2   : > { %723 = vrot.lane.b32.xlu1 %v642_v3, %s2443_s16  ;;  %s1875_s16 = scalar_lea.sflag [#allocation3], %s375_s25 }
 0x340   : > { %v734_v8 = vpop.permute.xlu1 %733 }
 0x341   : > { %v744_v15 = vsel %vm437_vm12, %v712_v54, %v734_v8 }
 0x344   : > { %v738_v9 = vpop.permute.xlu1 %737 }
 0x345   : > { %v745_v16 = vsel %vm727_vm0, %v744_v15, %v738_v9 }
 0x348   : > { %v718_v10 = vpop.permute.xlu1 %717 }
 0x349   : > { %v726_v20 = vsel %vm437_vm12, %v642_v3, %v718_v10 }
 0x34c   : > { %v742_v14 = vpop.permute.xlu1 %741 }
 0x34d   : > { %v746_v19 = vsel %vm729_vm1, %v745_v16, %v742_v14 }
 0x34e   : > { %v750_v21 = vrot.slane %v746_v19, %v749_v17 }
 0x350   : > { %v721_v18 = vpop.permute.xlu1 %720 }
 0x351   : > { %v728_v22 = vsel %vm727_vm0, %v726_v20, %v721_v18 }
 0x354   : > { %v724_v23 = vpop.permute.xlu1 %723 }
 0x355   : > { %v730_v24 = vsel %vm729_vm1, %v728_v22, %v724_v23 }
 0x356   : > { %v751_v25 = vadd.f32 %v750_v21, %v730_v24 }
 0x358   : > { %vm752_vm2 = vcmp.ge.f32.partialorder %v751_v25, 0.0  ;;  %v753_v26 = vmul.f32 0.2, %v751_v25 }
 0x35a   : > { %v754_v27 = vsel %vm752_vm2, %v751_v25, %v753_v26 }
 0x35b   : > { %2077 = vmatmul.mubr.msk.f32.vlgmr.msra.gmra.mrb[2].mxu1 %vm764_vm3, %v754_v27 }
 0x35c   : > { %2108 = vmatprep.mubr.msk.f32.mxu1 %vm2434_vm7, %v2435_v11  ;;  %2204 = vmatpush3.bf16.msra.mxu1 %v2674_v49 }
 0x35d   : > { %2205 = vmatprep.subr.bf16.mxu1 %v2432_v0 }
 0x360   : > { %2207 = vmatpush3.bf16.msra.mxu1 %v2684_v53 }
 0x361   : > { %2214 = vmatprep.subr.bf16.mxu1 %v2432_v0 }
 0x42e   : > { %v834_v29 = vpop.f32.mrb[2].mxu1 }
 0x42f   : > { %v835_v30 = vadd.f32 %v834_v29, %v763_v28  ;;  %v2078_v31 = vpop.f32.mrb[3].mxu1 }
 0x431   : > { %v839_v32 = vsel %vm838_vm4, %v835_v30, -inf }
 0x432   : > { %840 = vmax.xlane.f32.xlu1 %v839_v32 }
 0x4bf   : > { %v841_v33 = vpop.xlane.xlu1 %840 }
 0x4c0   : > { %v842_v34 = vsub.f32 %v835_v30, %v841_v33 }
 0x4c2   : > { %v843_v35 = vmul.f32 1.442695, %v842_v34 }
 0x4c4   : > { %2296 = vpow2.f32 %v843_v35 }
 0x4ce   : > { %v2297_v36 = vpop.eup %2296 }
 0x4cf   : > { %v845_v37 = vsel %vm838_vm4, %v2297_v36, 0.0 }
 0x4d0   : > { %846 = vadd.xlane.f32.xlu0 %v845_v37 }
 0x55d   : > { %v847_v38 = vpop.xlane.xlu0 %846 }
 0x55e   : > { %2298 = vrcp.f32 %v847_v38 }
 0x568   : > { %v2299_v39 = vpop.eup %2298 }
 0x569   : > { %v849_v40 = vmul.f32 %v2299_v39, %v2297_v36 }
 0x56b   : > { %2080 = vmatpush3.xpose.msk.msra.mxu0 %vm431_vm9, %v849_v40 }
 0x56c   : > { %2084 = vmatprep.subr.mxu0 %v2435_v11 }
 0x56e   : > { %2082 = vmatmul.mubr.msk.f32.vlgmr.msra.gmra.mrb[4].mxu0 %vm431_vm9, %v2605_v48 }
 0x56f   : > { %2086 = vmatprep.mubr.msk.f32.mxu0 %vm2434_vm7, %v2435_v11  ;;  %2085 = vmatpush3.msra.mxu0 %v937_v41 }
 0x570   : > { %2196 = vmatprep.subr.bf16.mxu0 %v2432_v0 }
 0x641   : > { %v922_v42 = vpop.f32.mrb[4].mxu0 }
 0x642   : > { %v1956_v43 = vmul.f32 -1.442695, %v922_v42  ;;  %v2083_v44 = vpop.f32.mrb[5].mxu0 }
 0x644   : > { %2300 = vpow2.f32 %v1956_v43 }
 0x64e   : > { %v2301_v47 = vpop.eup %2300 }
 0x64f   : > { %v929_v50 = vadd.f32 1.0, %v2301_v47 }
 0x651   : > { %2302 = vrcp.f32 %v929_v50 }
 0x65b   : > { %v2303_v54 = vpop.eup %2302 }
 0x65c   : > { %933 = vrot.lane.b32.xlu1 %v2303_v54, %s2436_s19 }
 0x6ce   : > { %v934_v55 = vpop.permute.xlu1 %933 }
 0x6cf   : > { %v936_v56 = vsel %vm431_vm9, %v2605_v48, %v934_v55 }
 0x6d0   : > { %2087 = vmatmul.mubr.msk.f32.vlgmr.msra.gmra.mrb[6].mxu0 %vm433_vm10, %v936_v56 }
 0x6d1   : > { %2198 = vmatpush3.bf16.msra.mxu0 %v2674_v49  ;;  %2097 = vmatprep.mubr.msk.f32.mxu0 %vm2434_vm7, %v2435_v11 }
 0x6d2   : > { %2199 = vmatprep.subr.bf16.mxu0 %v2432_v0 }
 0x6d5   : > { %2201 = vmatpush3.bf16.msra.mxu0 %v2684_v53 }
 0x6d6   : > { %2208 = vmatprep.subr.bf16.mxu0 %v2432_v0 }
 0x6d8   : > { %2098 = vmatmul.mubr.f32.vlgmr.msra.gmra.mrb[8].mxu0 %v2435_v11 }
 0x6d9   : > { %2210 = vmatpush3.bf16.msra.mxu0 %v2674_v49  ;;  %2119 = vmatprep.mubr.msk.f32.mxu0 %vm2434_vm7, %v2435_v11 }
 0x6da   : > { %2211 = vmatprep.subr.bf16.mxu0 %v2432_v0 }
 0x6dd   : > { %2213 = vmatpush3.bf16.msra.mxu0 %v2684_v53 }
 0x6de   : > { %2220 = vmatprep.subr.bf16.mxu0 %v2432_v0 }
 0x7a3   : > { %v1014_v48 = vpop.f32.mrb[6].mxu0 }
 0x7a4   : > { %v2088_v57 = vpop.f32.mrb[7].mxu0  ;;  %v2708_v59 = vadd.f32 %v1957_v58, %v1014_v48 }
 0x7ab   : > { %v1091_v60 = vpop.f32.mrb[8].mxu0 }
 0x7ac   : > { %v1095_v61 = vadd.f32 %v1091_v60, %v2708_v59  ;;  %v2099_v62 = vpop.f32.mrb[9].mxu0 }
 0x7ae   : > { %2304 = vtanh.f32 %v1095_v61  ;;  %v1959_v1 = vmul.f32 -1.442695, %v1095_v61 }
 0x7b0   : > { %2306 = vpow2.f32 %v1959_v1 }
 0x7b8   : > { %v2305_v63 = vpop.eup %2304 }
 0x7b9   : > { %1105 = vrot.lane.b32.xlu0 %v2305_v63, %s2444_s24 }
 0x7ba   : > { %v2307_v2 = vpop.eup %2306 }
 0x7bb   : > { %v1099_v3 = vadd.f32 1.0, %v2307_v2 }
 0x7bd   : > { %2308 = vrcp.f32 %v1099_v3 }
 0x7c7   : > { %v2309_v4 = vpop.eup %2308 }
 0x7c8   : > { %v1103_v7 = vmul.f32 0.0, %v2309_v4 }
 0x82b   : > { %v1106_v5 = vpop.permute.xlu0 %1105 }
 0x82c   : > { %v1108_v6 = vmul.f32 %v2309_v4, %v1106_v5 }
 0x82e   : > { %1110 = vrot.lane.b32.xlu1 %v1108_v6, %s2442_s30 }
 0x8a0   : > { %v1111_v8 = vpop.permute.xlu1 %1110 }
 0x8a1   : > { %v1113_v9 = vadd.f32 %v1111_v8, %v1103_v7 }
 0x8a3   : > { %2310 = vtanh.f32 %v1113_v9  ;;  %v1207_v26 = vrot.slane %v1113_v9, 7 }
 0x8ad   : > { %v2311_v10 = vpop.eup %2310 }
 0x8ae   : > { %1116 = vrot.lane.b32.xlu1 %v2311_v10, %s2444_s24 }
 0x920   : > { %v1117_v12 = vpop.permute.xlu1 %1116 }
 0x921   : > { %v1119_v13 = vmul.f32 %v2309_v4, %v1117_v12 }
 0x923   : > { %1121 = vrot.lane.b32.xlu1 %v1119_v13, %s2442_s30 }
 0x995   : > { %v1122_v14 = vpop.permute.xlu1 %1121 }
 0x996   : > { %2109 = vmatmul.mubr.msk.f32.vlgmr.msra.gmra.mrb[4].mxu1 %vm727_vm0, %v1122_v14 }
 0x997   : > { %2216 = vmatpush3.bf16.msra.mxu1 %v2674_v49  ;;  %2130 = vmatprep.mubr.msk.f32.mxu1 %vm2434_vm7, %v2435_v11 }
 0x998   : > { %2217 = vmatprep.subr.bf16.mxu1 %v2432_v0 }
 0x99b   : > { %2219 = vmatpush3.bf16.msra.mxu1 %v2684_v53 }
 0x99c   : > { %2226 = vmatprep.subr.bf16.mxu1 %v2432_v0 }
 0xa69   : > { %v1191_v15 = vpop.f32.mrb[4].mxu1 }
 0xa6a   : > { %v1196_v16 = vrot.slane %v1191_v15, 7  ;;  %v2110_v17 = vpop.f32.mrb[5].mxu1 }
 0xa6c   : > { %v1198_v18 = vadd.f32 %v1196_v16, %v2708_v59 }
 0xa6e   : > { %2312 = vtanh.f32 %v1198_v18  ;;  %v1961_v20 = vmul.f32 -1.442695, %v1198_v18 }
 0xa70   : > { %2314 = vpow2.f32 %v1961_v20 }
 0xa78   : > { %v2313_v19 = vpop.eup %2312 }
 0xa79   : > { %1211 = vrot.lane.b32.xlu1 %v2313_v19, %s2444_s24 }
 0xa7a   : > { %v2315_v21 = vpop.eup %2314 }
 0xa7b   : > { %v1202_v22 = vadd.f32 1.0, %v2315_v21 }
 0xa7d   : > { %2316 = vrcp.f32 %v1202_v22 }
 0xa87   : > { %v2317_v23 = vpop.eup %2316 }
 0xa88   : > { %v1209_v27 = vmul.f32 %v2317_v23, %v1207_v26 }
 0xaeb   : > { %v1212_v24 = vpop.permute.xlu1 %1211 }
 0xaec   : > { %v1214_v25 = vmul.f32 %v2317_v23, %v1212_v24 }
 0xaee   : > { %1216 = vrot.lane.b32.xlu1 %v1214_v25, %s2442_s30 }
 0xb60   : > { %v1217_v28 = vpop.permute.xlu1 %1216 }
 0xb61   : > { %v1219_v29 = vadd.f32 %v1217_v28, %v1209_v27 }
 0xb63   : > { %2318 = vtanh.f32 %v1219_v29  ;;  %v1314_v46 = vrot.slane %v1219_v29, 7 }
 0xb6d   : > { %v2319_v30 = vpop.eup %2318 }
 0xb6e   : > { %1222 = vrot.lane.b32.xlu0 %v2319_v30, %s2444_s24 }
 0xbe0   : > { %v1223_v31 = vpop.permute.xlu0 %1222 }
 0xbe1   : > { %v1225_v32 = vmul.f32 %v2317_v23, %v1223_v31 }
 0xbe3   : > { %v1227_v33 = vrot.slane %v1225_v32, 1 }
 0xbe5   : > { %1228 = vrot.lane.b32.xlu1 %v1227_v33, %s2442_s30 }
 0xc57   : > { %v1229_v34 = vpop.permute.xlu1 %1228 }
 0xc58   : > { %2120 = vmatmul.mubr.msk.f32.vlgmr.msra.gmra.mrb[10].mxu0 %vm727_vm0, %v1229_v34 }
 0xc59   : > { %2222 = vmatpush3.bf16.msra.mxu0 %v2674_v49  ;;  %2141 = vmatprep.mubr.msk.f32.mxu0 %vm2434_vm7, %v2435_v11 }
 0xc5a   : > { %2223 = vmatprep.subr.bf16.mxu0 %v2432_v0 }
 0xc5d   : > { %2225 = vmatpush3.bf16.msra.mxu0 %v2684_v53 }
 0xc5e   : > { %2232 = vmatprep.subr.bf16.mxu0 %v2432_v0 }
 0xd2b   : > { %v1298_v35 = vpop.f32.mrb[10].mxu0 }
 0xd2c   : > { %v1303_v36 = vrot.slane %v1298_v35, 6  ;;  %v2121_v37 = vpop.f32.mrb[11].mxu0 }
 0xd2e   : > { %v1305_v38 = vadd.f32 %v1303_v36, %v2708_v59 }
 0xd30   : > { %2320 = vtanh.f32 %v1305_v38  ;;  %v1963_v40 = vmul.f32 -1.442695, %v1305_v38 }
 0xd32   : > { %2322 = vpow2.f32 %v1963_v40 }
 0xd3a   : > { %v2321_v39 = vpop.eup %2320 }
 0xd3b   : > { %1318 = vrot.lane.b32.xlu0 %v2321_v39, %s2444_s24 }
 0xd3c   : > { %v2323_v41 = vpop.eup %2322 }
 0xd3d   : > { %v1309_v42 = vadd.f32 1.0, %v2323_v41 }
 0xd3f   : > { %2324 = vrcp.f32 %v1309_v42 }
 0xd49   : > { %v2325_v43 = vpop.eup %2324 }
 0xd4a   : > { %v1316_v47 = vmul.f32 %v2325_v43, %v1314_v46 }
 0xdad   : > { %v1319_v44 = vpop.permute.xlu0 %1318 }
 0xdae   : > { %v1321_v45 = vmul.f32 %v2325_v43, %v1319_v44 }
 0xdb0   : > { %1323 = vrot.lane.b32.xlu1 %v1321_v45, %s2442_s30 }
 0xe22   : > { %v1324_v50 = vpop.permute.xlu1 %1323 }
 0xe23   : > { %v1326_v51 = vadd.f32 %v1324_v50, %v1316_v47 }
 0xe25   : > { %2326 = vtanh.f32 %v1326_v51  ;;  %v1421_v6 = vrot.slane %v1326_v51, 7 }
 0xe2f   : > { %v2327_v52 = vpop.eup %2326 }
 0xe30   : > { %1329 = vrot.lane.b32.xlu0 %v2327_v52, %s2444_s24 }
 0xea2   : > { %v1330_v54 = vpop.permute.xlu0 %1329 }
 0xea3   : > { %v1332_v55 = vmul.f32 %v2325_v43, %v1330_v54 }
 0xea5   : > { %v1334_v56 = vrot.slane %v1332_v55, 2 }
 0xea7   : > { %1335 = vrot.lane.b32.xlu1 %v1334_v56, %s2442_s30 }
 0xf19   : > { %v1336_v48 = vpop.permute.xlu1 %1335 }
 0xf1a   : > { %2131 = vmatmul.mubr.msk.f32.vlgmr.msra.gmra.mrb[6].mxu1 %vm727_vm0, %v1336_v48 }
 0xf1b   : > { %2228 = vmatpush3.bf16.msra.mxu1 %v2674_v49  ;;  %2152 = vmatprep.mubr.msk.f32.mxu1 %vm2434_vm7, %v2435_v11 }
 0xf1c   : > { %2229 = vmatprep.subr.bf16.mxu1 %v2432_v0 }
 0xf1f   : > { %2231 = vmatpush3.bf16.msra.mxu1 %v2684_v53 }
 0xf20   : > { %2238 = vmatprep.subr.bf16.mxu1 %v2432_v0 }
 0xfed   : > { %v1405_v57 = vpop.f32.mrb[6].mxu1 }
 0xfee   : > { %v1410_v58 = vrot.slane %v1405_v57, 5  ;;  %v2132_v60 = vpop.f32.mrb[7].mxu1 }
 0xff0   : > { %v1412_v61 = vadd.f32 %v1410_v58, %v2708_v59 }
 0xff2   : > { %2328 = vtanh.f32 %v1412_v61  ;;  %v1965_v63 = vmul.f32 -1.442695, %v1412_v61 }
 0xff4   : > { %2330 = vpow2.f32 %v1965_v63 }
 0xffc   : > { %v2329_v62 = vpop.eup %2328 }
 0xffd   : > { %1425 = vrot.lane.b32.xlu0 %v2329_v62, %s2444_s24 }
 0xffe   : > { %v2331_v1 = vpop.eup %2330 }
 0xfff   : > { %v1416_v2 = vadd.f32 1.0, %v2331_v1 }
0x1001   : > { %2332 = vrcp.f32 %v1416_v2 }
0x100b   : > { %v2333_v3 = vpop.eup %2332 }
0x100c   : > { %v1423_v7 = vmul.f32 %v2333_v3, %v1421_v6 }
0x106f   : > { %v1426_v4 = vpop.permute.xlu0 %1425 }
0x1070   : > { %v1428_v5 = vmul.f32 %v2333_v3, %v1426_v4 }
0x1072   : > { %1430 = vrot.lane.b32.xlu1 %v1428_v5, %s2442_s30 }
0x10e4   : > { %v1431_v8 = vpop.permute.xlu1 %1430 }
0x10e5   : > { %v1433_v9 = vadd.f32 %v1431_v8, %v1423_v7 }
0x10e7   : > { %2334 = vtanh.f32 %v1433_v9  ;;  %v1528_v27 = vrot.slane %v1433_v9, 7 }
0x10f1   : > { %v2335_v10 = vpop.eup %2334 }
0x10f2   : > { %1436 = vrot.lane.b32.xlu0 %v2335_v10, %s2444_s24 }
0x1164   : > { %v1437_v12 = vpop.permute.xlu0 %1436 }
0x1165   : > { %v1439_v13 = vmul.f32 %v2333_v3, %v1437_v12 }
0x1167   : > { %v1441_v14 = vrot.slane %v1439_v13, 3 }
0x1169   : > { %1442 = vrot.lane.b32.xlu1 %v1441_v14, %s2442_s30 }
0x11db   : > { %v1443_v15 = vpop.permute.xlu1 %1442 }
0x11dc   : > { %2142 = vmatmul.mubr.msk.f32.vlgmr.msra.gmra.mrb[12].mxu0 %vm727_vm0, %v1443_v15 }
0x11dd   : > { %2234 = vmatpush3.bf16.msra.mxu0 %v2674_v49  ;;  %2163 = vmatprep.mubr.msk.f32.mxu0 %vm2434_vm7, %v2435_v11 }
0x11de   : > { %2235 = vmatprep.subr.bf16.mxu0 %v2432_v0 }
0x11e1   : > { %2237 = vmatpush3.bf16.msra.mxu0 %v2684_v53 }
0x12af   : > { %v1512_v16 = vpop.f32.mrb[12].mxu0 }
0x12b0   : > { %v1517_v17 = vrot.slane %v1512_v16, 4  ;;  %v2143_v18 = vpop.f32.mrb[13].mxu0 }
0x12b2   : > { %v1519_v19 = vadd.f32 %v1517_v17, %v2708_v59 }
0x12b4   : > { %2336 = vtanh.f32 %v1519_v19  ;;  %v1967_v21 = vmul.f32 -1.442695, %v1519_v19 }
0x12b6   : > { %2338 = vpow2.f32 %v1967_v21 }
0x12be   : > { %v2337_v20 = vpop.eup %2336 }
0x12bf   : > { %1532 = vrot.lane.b32.xlu0 %v2337_v20, %s2444_s24 }
0x12c0   : > { %v2339_v22 = vpop.eup %2338 }
0x12c1   : > { %v1523_v23 = vadd.f32 1.0, %v2339_v22 }
0x12c3   : > { %2340 = vrcp.f32 %v1523_v23 }
0x12cd   : > { %v2341_v24 = vpop.eup %2340 }
0x12ce   : > { %v1530_v28 = vmul.f32 %v2341_v24, %v1528_v27 }
0x1331   : > { %v1533_v25 = vpop.permute.xlu0 %1532 }
0x1332   : > { %v1535_v26 = vmul.f32 %v2341_v24, %v1533_v25 }
0x1334   : > { %1537 = vrot.lane.b32.xlu1 %v1535_v26, %s2442_s30 }
0x13a6   : > { %v1538_v29 = vpop.permute.xlu1 %1537 }
0x13a7   : > { %v1540_v30 = vadd.f32 %v1538_v29, %v1530_v28 }
0x13a9   : > { %2342 = vtanh.f32 %v1540_v30 }
0x13b3   : > { %v2343_v31 = vpop.eup %2342 }
0x13b4   : > { %1543 = vrot.lane.b32.xlu0 %v2343_v31, %s2444_s24 }
0x1426   : > { %v1544_v32 = vpop.permute.xlu0 %1543 }
0x1427   : > { %v1546_v33 = vmul.f32 %v2341_v24, %v1544_v32 }
0x1429   : > { %v1548_v34 = vrot.slane %v1546_v33, 4 }
0x142b   : > { %1549 = vrot.lane.b32.xlu1 %v1548_v34, %s2442_s30 }
0x149d   : > { %v1550_v35 = vpop.permute.xlu1 %1549 }
0x149e   : > { %2153 = vmatmul.mubr.msk.f32.vlgmr.msra.gmra.mrb[8].mxu1 %vm727_vm0, %v1550_v35 }
0x149f   : > { %2240 = vmatpush3.bf16.msra.mxu1 %v2674_v49  ;;  %2174 = vmatprep.mubr.msk.f32.mxu1 %vm2434_vm7, %v2435_v11 }
0x14a0   : > { %2241 = vmatprep.subr.bf16.mxu1 %v2432_v0  ;;  %v1635_v0 = vrot.slane %v1540_v30, 7 }
0x14a3   : > { %2243 = vmatpush3.bf16.msra.mxu1 %v2684_v53 }
0x1571   : > { %v1619_v36 = vpop.f32.mrb[8].mxu1 }
0x1572   : > { %v1624_v37 = vrot.slane %v1619_v36, 3  ;;  %v2154_v38 = vpop.f32.mrb[9].mxu1 }
0x1574   : > { %v1626_v39 = vadd.f32 %v1624_v37, %v2708_v59 }
0x1576   : > { %2344 = vtanh.f32 %v1626_v39  ;;  %v1969_v41 = vmul.f32 -1.442695, %v1626_v39 }
0x1578   : > { %2346 = vpow2.f32 %v1969_v41 }
0x1580   : > { %v2345_v40 = vpop.eup %2344 }
0x1581   : > { %1639 = vrot.lane.b32.xlu0 %v2345_v40, %s2444_s24 }
0x1582   : > { %v2347_v42 = vpop.eup %2346 }
0x1583   : > { %v1630_v49 = vadd.f32 1.0, %v2347_v42 }
0x1585   : > { %2348 = vrcp.f32 %v1630_v49 }
0x158f   : > { %v2349_v43 = vpop.eup %2348 }
0x1590   : > { %v1637_v53 = vmul.f32 %v2349_v43, %v1635_v0 }
0x15f3   : > { %v1640_v11 = vpop.permute.xlu0 %1639 }
0x15f4   : > { %v1642_v44 = vmul.f32 %v2349_v43, %v1640_v11 }
0x15f6   : > { %1644 = vrot.lane.b32.xlu1 %v1642_v44, %s2442_s30 }
0x1668   : > { %v1645_v45 = vpop.permute.xlu1 %1644 }
0x1669   : > { %v1647_v46 = vadd.f32 %v1645_v45, %v1637_v53 }
0x166b   : > { %2350 = vtanh.f32 %v1647_v46  ;;  %v1742_v3 = vrot.slane %v1647_v46, 7 }
0x1675   : > { %v2351_v47 = vpop.eup %2350 }
0x1676   : > { %1650 = vrot.lane.b32.xlu0 %v2351_v47, %s2444_s24 }
0x16e8   : > { %v1651_v50 = vpop.permute.xlu0 %1650 }
0x16e9   : > { %v1653_v51 = vmul.f32 %v2349_v43, %v1651_v50 }
0x16eb   : > { %v1655_v52 = vrot.slane %v1653_v51, 5 }
0x16ed   : > { %1656 = vrot.lane.b32.xlu1 %v1655_v52, %s2442_s30 }
0x175f   : > { %v1657_v54 = vpop.permute.xlu1 %1656 }
0x1760   : > { %2164 = vmatmul.mubr.msk.f32.vlgmr.msra.gmra.mrb[14].mxu0 %vm727_vm0, %v1657_v54 }
0x1833   : > { %v1726_v55 = vpop.f32.mrb[14].mxu0 }
0x1834   : > { %v1731_v56 = vrot.slane %v1726_v55, 2  ;;  %v2165_v48 = vpop.f32.mrb[15].mxu0 }
0x1836   : > { %v1733_v57 = vadd.f32 %v1731_v56, %v2708_v59 }
0x1838   : > { %2352 = vtanh.f32 %v1733_v57  ;;  %v1971_v60 = vmul.f32 -1.442695, %v1733_v57 }
0x183a   : > { %2354 = vpow2.f32 %v1971_v60 }
0x1842   : > { %v2353_v58 = vpop.eup %2352 }
0x1843   : > { %1746 = vrot.lane.b32.xlu0 %v2353_v58, %s2444_s24 }
0x1844   : > { %v2355_v61 = vpop.eup %2354 }
0x1845   : > { %v1737_v62 = vadd.f32 1.0, %v2355_v61 }
0x1847   : > { %2356 = vrcp.f32 %v1737_v62 }
0x1851   : > { %v2357_v63 = vpop.eup %2356 }
0x1852   : > { %v1744_v4 = vmul.f32 %v2357_v63, %v1742_v3 }
0x18b5   : > { %v1747_v1 = vpop.permute.xlu0 %1746 }
0x18b6   : > { %v1749_v2 = vmul.f32 %v2357_v63, %v1747_v1 }
0x18b8   : > { %1751 = vrot.lane.b32.xlu1 %v1749_v2, %s2442_s30 }
0x192a   : > { %v1752_v5 = vpop.permute.xlu1 %1751 }
0x192b   : > { %v1754_v6 = vadd.f32 %v1752_v5, %v1744_v4 }
0x192d   : > { %2358 = vtanh.f32 %v1754_v6  ;;  %v1849_v24 = vrot.slane %v1754_v6, 7 }
0x1937   : > { %v2359_v7 = vpop.eup %2358 }
0x1938   : > { %1757 = vrot.lane.b32.xlu0 %v2359_v7, %s2444_s24 }
0x19aa   : > { %v1758_v8 = vpop.permute.xlu0 %1757 }
0x19ab   : > { %v1760_v9 = vmul.f32 %v2357_v63, %v1758_v8 }
0x19ad   : > { %v1762_v10 = vrot.slane %v1760_v9, 6 }
0x19af   : > { %1763 = vrot.lane.b32.xlu1 %v1762_v10, %s2442_s30 }
0x1a21   : > { %v1764_v12 = vpop.permute.xlu1 %1763 }
0x1a22   : > { %2175 = vmatmul.mubr.msk.f32.vlgmr.msra.gmra.mrb[10].mxu1 %vm727_vm0, %v1764_v12 }
0x1af5   : > { %v1833_v13 = vpop.f32.mrb[10].mxu1 }
0x1af6   : > { %v1838_v14 = vrot.slane %v1833_v13, 1  ;;  %v2176_v15 = vpop.f32.mrb[11].mxu1 }
0x1af8   : > { %v1840_v16 = vadd.f32 %v1838_v14, %v2708_v59 }
0x1afa   : > { %2360 = vtanh.f32 %v1840_v16  ;;  %v1973_v18 = vmul.f32 -1.442695, %v1840_v16 }
0x1afc   : > { %2362 = vpow2.f32 %v1973_v18 }
0x1b04   : > { %v2361_v17 = vpop.eup %2360 }
0x1b05   : > { %1853 = vrot.lane.b32.xlu0 %v2361_v17, %s2444_s24 }
0x1b06   : > { %v2363_v19 = vpop.eup %2362 }
0x1b07   : > { %v1844_v20 = vadd.f32 1.0, %v2363_v19 }
0x1b09   : > { %2364 = vrcp.f32 %v1844_v20 }
0x1b13   : > { %v2365_v21 = vpop.eup %2364 }
0x1b14   : > { %v1851_v25 = vmul.f32 %v2365_v21, %v1849_v24 }
0x1b77   : > { %v1854_v22 = vpop.permute.xlu0 %1853 }
0x1b78   : > { %v1856_v23 = vmul.f32 %v2365_v21, %v1854_v22 }
0x1b7a   : > { %1858 = vrot.lane.b32.xlu1 %v1856_v23, %s2442_s30 }
0x1bec   : > { %v1859_v26 = vpop.permute.xlu1 %1858 }
0x1bed   : > { %v1861_v59 = vadd.f32 %v1859_v26, %v1851_v25 }
0x1bef   : > { %2366 = vtanh.f32 %v1861_v59 }
0x1bf9   : > { %v2367_v27 = vpop.eup %2366 }
0x1bfa   : > { %1864 = vrot.lane.b32.xlu0 %v2367_v27, %s2444_s24 }
0x1c6c   : > { %v1865_v28 = vpop.permute.xlu0 %1864 }
0x1c6d   : > { %v1867_v29 = vmul.f32 %v2365_v21, %v1865_v28 }
0x1c6f   : > { %1869 = vrot.lane.b32.xlu1 %v1867_v29, %s2442_s30  ;;  %s2372_s30 = sshll.u32 %s2445_s21, 4  ;;  %s2373_s30 = int_to_ptr.vmem [resolvable:$false] %s2372_s30 }
0x1c70   : > { %s2374_s19 = scalar_lea.vmem %s2373_s30, 32  ;;  %p2375_p0 = scmp.lt.s32.totalorder %s2792_s12, %s2373_s30 }
0x1c71   : > { %p2376_p1 = scmp.lt.s32.totalorder %s2374_s19, %s2368_s29 }
0x1c73   : > { %p2377_p2 = por %p2376_p1, %p2375_p0 }
0x1c75   : > { %p2378_p3 = pnand %p2377_p2, %p2371_p13 }
0x1ce1   : > { %v1870_v30 = vpop.permute.xlu1 %1869 }
0x1ce2   : > { %1873 = vst.msk [vmem:[%s376_s26 - $0x7] sm:$0x80] %vm1872_vm5, %v1870_v30 }
0x1ce3   : > { %2381 = shalt.err (!%p2378_p3)
}
0x1ce4   : > { %s2382_s22 = scalar_lea.hbm %s2790_s15, 16  ;;  %s2386_s23 = scalar_lea.hbm %s2843_s11, 32 }
0x1ce5   : > { %p2383_p4 = scmp.ne.s32.totalorder %s2790_s15, %s2382_s22  ;;  %p2387_p9 = scmp.lt.u32.totalorder %s2790_s15, %s2843_s11 }
0x1ce6   : > { %p2388_p10 = scmp.lt.u32.totalorder %s2386_s23, %s2382_s22  ;;  %p2390_p12 = scmp.lt.u32.totalorder %s2382_s22, %s2790_s15 }
0x1ce7   : > { %p2384_p7 = pnand %p2383_p4, %p2544_p5 }
0x1ce8   : > { %p2389_p11 = por %p2388_p10, %p2387_p9 }
0x1ce9   : > { %p2385_p8 = pneg %p2384_p7 }
0x1cea   : > { %p2391_p13 = por %p2390_p12, %p2389_p11 }
0x1cec   : > { %p2392_p0 = pnand %p2391_p13, %p2385_p8 }
0x1cee   : > { %2395 = shalt.err (!%p2392_p0)
}
0x1cef   : > { %2244 = dma.vmem_to_hbm [thread:$0]  (%p2544_p5), %s2792_s12, 16, %s2790_s15, %s1875_s16  }
0x1cf0 PF: > { %p2250_p1 = scmp.ge.s32.totalorder %s2430_s20, 2  ;;  %s1899_s14 = sand.u32 1, %s2418_s17  }
0x1cf1   : > { %s1900_s29 = scalar_lea.sflag [#allocation3], %s1899_s14 }
0x1cf2   : > { %p2247_p2 = pnand %p2250_p1, %p2548_p6 }
0x1cf4   : > { %2413 = dma.done.wait (!%p2247_p2), %s1900_s29, 16  }
0x1cf5   : > { %2415 = vsyncadd (!%p2247_p2), %s1900_s29, 4294967280  ;;  %s2852_s20 = sld [smem:[#allocation6_spill]]  ;;  %s2853_s21 = sld [smem:[#allocation5_spill]] }
0x1cf6   : > { %s2854_s19 = sld [smem:[#allocation7_spill]]  ;;  %s2855_s17 = smov %s2422_s18 }
0x1cfb   : > { %p21_p3 = scmp.ge.s32.totalorder %s2852_s20, 4   ;;  %s2856_s18 = smov %s2853_s21 }
0x1cfd   :  { %23 = sbr.rel (!%p21_p3) target bundleno = 3 (0x3), region = 99 }
0x1d04   :  { %1904 = vsyncpa [#allocation3], 1 }
0x1d05   :  { %1906 = vsyncpa [#allocation3 + $0x1], 1 }

</bundles_post_ra>
